<compile_context>
chip_gen: v6e
topology: v6e:2x2x1
jax: 0.10.0
libtpu: 0.0.40
codegen_flags: <defaults>
</compile_context>

<pallas_src>
import functools
import math

import jax
import jax.numpy as jnp
from jax.experimental import pallas as pl
from jax.experimental.pallas import tpu as pltpu


# ----------------------------------------------------------------------------
# Fused kernel: 6 x GINConv (+outer ReLU) -> Set2Set(6 steps) -> fc1 -> ReLU -> fc4
# ----------------------------------------------------------------------------
def _netgine_fused_kernel(
    eps_ref,                                   # SMEM (6,) f32
    x_ref, ea_ref, src_ref, dstT_ref, mask_ref,
    wb1_1, bb1_1, wb2_1, bb2_1, wm1_1, bm1_1, wm2_1, bm2_1,        # conv1
    wb1_s, bb1_s, wb2_s, bb2_s, wm1_s, bm1_s, wm2_s, bm2_s,        # convs 2..6 stacked
    wihq_ref, wihr_ref, whh_ref, bih_ref, bhh_ref,                 # Set2Set LSTM (wih split)
    w1q_ref, w1r_ref, b1_ref, w4_ref, b4_ref,                      # head (fc1 split)
    out_ref, *, dim, steps):
  f32 = jnp.float32
  bf16 = jnp.bfloat16

  ea = ea_ref[...]                          # [E, 4]  f32
  src = src_ref[...]                        # [E, N]  bf16 one-hot gather operator
  dstT = dstT_ref[...]                      # [N, E]  bf16 one-hot scatter-add operator

  def gine_conv(h, wb1, bb1, wb2, bb2, wm1, bm1, wm2, bm2, eps):
    # bond_encoder: Linear -> ReLU -> Linear on edge_attr
    e = jnp.maximum(jnp.dot(ea, wb1, preferred_element_type=f32) + bb1, 0.0)
    e = jnp.dot(e, wb2, preferred_element_type=f32) + bb2
    # gather x_j per edge (bf16 x bf16 -> f32 MXU), message = relu(x_j + e)
    x_src = jnp.dot(src, h.astype(bf16), preferred_element_type=f32)     # [E, D]
    msg = jnp.maximum(x_src + e, 0.0)
    # scatter-add messages to destination nodes (bf16 x bf16 -> f32 MXU)
    aggr = jnp.dot(dstT, msg.astype(bf16), preferred_element_type=f32)   # [N, D]
    # mlp((1+eps)*x + aggr)
    z = (1.0 + eps) * h + aggr
    z = jnp.maximum(jnp.dot(z, wm1, preferred_element_type=f32) + bm1, 0.0)
    z = jnp.dot(z, wm2, preferred_element_type=f32) + bm2
    # outer F.relu from NetGINE.forward
    return jnp.maximum(z, 0.0)

  # ---- conv stack ---------------------------------------------------------
  h = gine_conv(x_ref[...],
                wb1_1[...], bb1_1[...], wb2_1[...], bb2_1[...],
                wm1_1[...], bm1_1[...], wm2_1[...], bm2_1[...], eps_ref[0])

  def conv_body(l, h_carry):                 # layers 2..6, stacked-weight indexing
    return gine_conv(h_carry,
                     wb1_s[l], bb1_s[l], wb2_s[l], bb2_s[l],
                     wm1_s[l], bm1_s[l], wm2_s[l], bm2_s[l],
                     eps_ref[l + 1])

  h = jax.lax.fori_loop(0, 5, conv_body, h)                        # [N, dim] f32

  # ---- Set2Set pooling ----------------------------------------------------
  mask = mask_ref[...]                                             # [B, N] 0/1 membership
  B = mask.shape[0]
  wih_q = wihq_ref[...]                                            # [d, 4d]
  wih_r = wihr_ref[...]                                            # [d, 4d]
  whh = whh_ref[...]                                               # [d, 4d]
  b_gate = bih_ref[...] + bhh_ref[...]                             # hoisted constant bias

  def s2s_body(_, carry):
    h_l, c, q, r = carry
    # LSTM cell (torch gate order i, f, g, o); q_star = [q, r] handled via split wih
    gates = (jnp.dot(q, wih_q, preferred_element_type=f32)
             + jnp.dot(r, wih_r, preferred_element_type=f32)
             + jnp.dot(h_l, whh, preferred_element_type=f32) + b_gate)
    ig = jax.nn.sigmoid(gates[:, 0:dim])
    fg = jax.nn.sigmoid(gates[:, dim:2 * dim])
    gg = jnp.tanh(gates[:, 2 * dim:3 * dim])
    og = jax.nn.sigmoid(gates[:, 3 * dim:4 * dim])
    c_new = fg * c + ig * gg
    h_new = og * jnp.tanh(c_new)
    q_new = h_new                                                  # [B, d]

    # attention: e_n = x_n . q_{batch(n)} -> segment softmax -> weighted sum
    # contract on the feature axis (no transpose of h materialized per step)
    scores = jax.lax.dot_general(q_new, h, (((1,), (1,)), ((), ())),
                                 preferred_element_type=f32)       # [B, N]
    scores = jnp.where(mask > 0, scores, -1e30)
    scores = scores - jnp.max(scores, axis=1, keepdims=True)
    p = jnp.exp(scores)                                            # masked entries -> 0
    denom = jnp.maximum(jnp.sum(p, axis=1, keepdims=True), 1e-30)  # empty-graph guard
    p = p * pl.reciprocal(denom, approx=True)                      # EUP divide
    r_new = jnp.dot(p, h, preferred_element_type=f32)              # [B, d]
    return h_new, c_new, q_new, r_new

  z0 = jnp.zeros((B, dim), f32)
  _, _, q, r = jax.lax.fori_loop(0, steps, s2s_body, (z0, z0, z0, z0))

  # ---- head: fc1(q_star) -> ReLU -> fc4 (q_star concat avoided via split w1) ----
  y = jnp.maximum(jnp.dot(q, w1q_ref[...], preferred_element_type=f32)
                  + jnp.dot(r, w1r_ref[...], preferred_element_type=f32)
                  + b1_ref[...], 0.0)
  out_ref[...] = jnp.dot(y, w4_ref[...], preferred_element_type=f32) + b4_ref[...]


# ----------------------------------------------------------------------------
# Wrapper (single fused pallas_call; arrays resident in VMEM, eps in SMEM)
# ----------------------------------------------------------------------------
def net_gine_forward(params, x, edge_attr, src_oh, dstT_oh, batch_mask, *, steps=6):
  c1 = params["conv1"]
  cs = params["convs_rest"]          # each entry stacked [5, ...]
  s2s = params["s2s"]
  hd = params["head"]
  dim = s2s["whh"].shape[0]
  n_graphs = batch_mask.shape[0]
  n_out = hd["w4"].shape[1]
  n_nodes, _ = x.shape
  n_edges = edge_attr.shape[0]

  # split LSTM input weight and fc1 weight so the kernel never concatenates [q, r]
  wih_q, wih_r = s2s["wih"][:dim], s2s["wih"][dim:]
  w1_q, w1_r = hd["w1"][:dim], hd["w1"][dim:]

  args = (params["eps_all"],
          x, edge_attr, src_oh, dstT_oh, batch_mask,
          c1["wb1"], c1["bb1"], c1["wb2"], c1["bb2"],
          c1["wm1"], c1["bm1"], c1["wm2"], c1["bm2"],
          cs["wb1"], cs["bb1"], cs["wb2"], cs["bb2"],
          cs["wm1"], cs["bm1"], cs["wm2"], cs["bm2"],
          wih_q, wih_r, s2s["whh"], s2s["bih"], s2s["bhh"],
          w1_q, w1_r, hd["b1"], hd["w4"], hd["b4"])

  in_specs = ([pl.BlockSpec(memory_space=pltpu.MemorySpace.SMEM)]
              + [pl.BlockSpec(memory_space=pltpu.MemorySpace.VMEM)] * (len(args) - 1))

  # rough advisory cost estimate for the XLA scheduler
  bytes_accessed = sum(int(a.size) * a.dtype.itemsize for a in args) + n_graphs * n_out * 4
  flops = 0
  for _ in range(6):
    flops += 2 * 2 * n_edges * n_nodes * dim        # gather + scatter matmuls
    flops += 2 * 2 * n_edges * dim * dim            # bond encoder
    flops += 2 * 2 * n_nodes * dim * dim            # mlp
  flops += steps * 2 * (n_graphs * 2 * dim * 4 * dim + n_graphs * dim * 4 * dim
                        + 2 * n_graphs * n_nodes * dim)
  transcendentals = steps * n_graphs * 5 * dim
  ce = pl.CostEstimate(flops=flops, transcendentals=transcendentals,
                       bytes_accessed=bytes_accessed)

  # explicit scoped-VMEM budget sized to the resident set (with working headroom)
  vmem_limit = int(min(96 * 1024 * 1024, max(32 * 1024 * 1024, 4 * bytes_accessed)))

  return pl.pallas_call(
      functools.partial(_netgine_fused_kernel, dim=dim, steps=steps),
      out_shape=jax.ShapeDtypeStruct((n_graphs, n_out), jnp.float32),
      in_specs=in_specs,
      out_specs=pl.BlockSpec(memory_space=pltpu.MemorySpace.VMEM),
      compiler_params=pltpu.CompilerParams(vmem_limit_bytes=vmem_limit),
      cost_estimate=ce,
  )(*args)


# ----------------------------------------------------------------------------
# Parameter initialization (deterministic, torch-Linear-like uniform init)
# Weights stored [in, out]; biases [1, out]  (y = x @ W + b).
# ----------------------------------------------------------------------------
def _linear(key, fan_in, fan_out):
  kw, kb = jax.random.split(key)
  bound = 1.0 / math.sqrt(fan_in)
  w = jax.random.uniform(kw, (fan_in, fan_out), jnp.float32, -bound, bound)
  b = jax.random.uniform(kb, (1, fan_out), jnp.float32, -bound, bound)
  return w, b


def _gine_conv_params(key, emb_dim, dim1, dim2):
  ks = jax.random.split(key, 4)
  wb1, bb1 = _linear(ks[0], emb_dim, dim1)
  wb2, bb2 = _linear(ks[1], dim1, dim1)
  wm1, bm1 = _linear(ks[2], dim1, dim1)
  wm2, bm2 = _linear(ks[3], dim1, dim2)
  return dict(wb1=wb1, bb1=bb1, wb2=wb2, bb2=bb2,
              wm1=wm1, bm1=bm1, wm2=wm2, bm2=bm2)


def make_netgine_params(key, dim, num_features=6, edge_dim=4, n_out=12):
  keys = jax.random.split(key, 10)
  conv1 = _gine_conv_params(keys[0], edge_dim, num_features, dim)
  rest = [_gine_conv_params(keys[1 + i], edge_dim, dim, dim) for i in range(5)]
  convs_rest = {k: jnp.stack([r[k] for r in rest]) for k in rest[0]}  # each [5, ...]
  eps_all = jnp.zeros((6,), jnp.float32)                              # torch init: eps = 0
  # Set2Set LSTM: input 2*dim, hidden dim, gates 4*dim (torch order i,f,g,o)
  wih, bih = _linear(keys[6], 2 * dim, 4 * dim)
  whh, bhh = _linear(keys[7], dim, 4 * dim)
  s2s = dict(wih=wih, whh=whh, bih=bih, bhh=bhh)
  w1, b1 = _linear(keys[8], 2 * dim, dim)
  w4, b4 = _linear(keys[9], dim, n_out)
  return dict(conv1=conv1, convs_rest=convs_rest, eps_all=eps_all,
              s2s=s2s, head=dict(w1=w1, b1=b1, w4=w4, b4=b4))


if __name__ == "__main__":
  key = jax.random.PRNGKey(0)
  dim = 32            # hidden dim of NetGINE
  num_features = 6    # node feature dim (Alchemy)
  edge_dim = 4        # edge feature dim (bond features)
  n_nodes = 16        # 2 graphs x 8 nodes
  n_edges = 32        # 2 graphs x 16 edges
  n_graphs = 2

  kx, ke, ks, kd, kp = jax.random.split(key, 5)
  x = jax.random.normal(kx, (n_nodes, num_features), jnp.float32)
  edge_attr = jax.random.normal(ke, (n_edges, edge_dim), jnp.float32)

  # edges stay within each graph (graph0: nodes 0..7, graph1: nodes 8..15)
  src0 = jax.random.randint(ks, (16,), 0, 8)
  dst0 = jax.random.randint(kd, (16,), 0, 8)
  src = jnp.concatenate([src0, src0 + 8])
  dst = jnp.concatenate([dst0, dst0 + 8])
  batch = jnp.concatenate([jnp.zeros((8,), jnp.int32), jnp.ones((8,), jnp.int32)])

  # dense one-hot gather/scatter operators in bf16 (exact for 0/1) and batch mask
  src_oh = jax.nn.one_hot(src, n_nodes, dtype=jnp.bfloat16)            # [E, N]
  dstT_oh = jax.nn.one_hot(dst, n_nodes, dtype=jnp.bfloat16).T         # [N, E]
  batch_mask = jax.nn.one_hot(batch, n_graphs, dtype=jnp.float32).T    # [B, N]

  params = make_netgine_params(kp, dim, num_features, edge_dim, n_out=12)

  out = net_gine_forward(params, x, edge_attr, src_oh, dstT_oh, batch_mask, steps=6)
  out = jax.block_until_ready(out)
  assert out.shape == (n_graphs, 12) and out.dtype == jnp.float32
  print("KERNEL_OK")
</pallas_src>

<mosaic_0001>
module attributes {stable_mosaic.version = 11 : i64} {
  func.func @_netgine_fused_kernel(%arg0: memref<6xf32, #tpu.memory_space<smem>>, %arg1: memref<16x6xf32, #tpu.memory_space<vmem>>, %arg2: memref<32x4xf32, #tpu.memory_space<vmem>>, %arg3: memref<32x16xbf16, #tpu.memory_space<vmem>>, %arg4: memref<16x32xbf16, #tpu.memory_space<vmem>>, %arg5: memref<2x16xf32, #tpu.memory_space<vmem>>, %arg6: memref<4x6xf32, #tpu.memory_space<vmem>>, %arg7: memref<1x6xf32, #tpu.memory_space<vmem>>, %arg8: memref<6x6xf32, #tpu.memory_space<vmem>>, %arg9: memref<1x6xf32, #tpu.memory_space<vmem>>, %arg10: memref<6x6xf32, #tpu.memory_space<vmem>>, %arg11: memref<1x6xf32, #tpu.memory_space<vmem>>, %arg12: memref<6x32xf32, #tpu.memory_space<vmem>>, %arg13: memref<1x32xf32, #tpu.memory_space<vmem>>, %arg14: memref<5x4x32xf32, #tpu.memory_space<vmem>>, %arg15: memref<5x1x32xf32, #tpu.memory_space<vmem>>, %arg16: memref<5x32x32xf32, #tpu.memory_space<vmem>>, %arg17: memref<5x1x32xf32, #tpu.memory_space<vmem>>, %arg18: memref<5x32x32xf32, #tpu.memory_space<vmem>>, %arg19: memref<5x1x32xf32, #tpu.memory_space<vmem>>, %arg20: memref<5x32x32xf32, #tpu.memory_space<vmem>>, %arg21: memref<5x1x32xf32, #tpu.memory_space<vmem>>, %arg22: memref<32x128xf32, #tpu.memory_space<vmem>>, %arg23: memref<32x128xf32, #tpu.memory_space<vmem>>, %arg24: memref<32x128xf32, #tpu.memory_space<vmem>>, %arg25: memref<1x128xf32, #tpu.memory_space<vmem>>, %arg26: memref<1x128xf32, #tpu.memory_space<vmem>>, %arg27: memref<32x32xf32, #tpu.memory_space<vmem>>, %arg28: memref<32x32xf32, #tpu.memory_space<vmem>>, %arg29: memref<1x32xf32, #tpu.memory_space<vmem>>, %arg30: memref<32x12xf32, #tpu.memory_space<vmem>>, %arg31: memref<1x12xf32, #tpu.memory_space<vmem>>, %arg32: memref<2x12xf32, #tpu.memory_space<vmem>>) attributes {dimension_semantics = [], scalar_prefetch = 0 : i64, scratch_operands = 0 : i64, tpu.core_type = #tpu.core_type<tc>} {
    %c0 = arith.constant 0 : index
    %c0_0 = arith.constant 0 : index
    %0 = vector.load %arg2[%c0, %c0_0] : memref<32x4xf32, #tpu.memory_space<vmem>>, vector<32x4xf32>
    %c0_1 = arith.constant 0 : index
    %c0_2 = arith.constant 0 : index
    %1 = vector.load %arg3[%c0_1, %c0_2] : memref<32x16xbf16, #tpu.memory_space<vmem>>, vector<32x16xbf16>
    %c0_3 = arith.constant 0 : index
    %c0_4 = arith.constant 0 : index
    %2 = vector.load %arg4[%c0_3, %c0_4] : memref<16x32xbf16, #tpu.memory_space<vmem>>, vector<16x32xbf16>
    %c0_5 = arith.constant 0 : index
    %c0_6 = arith.constant 0 : index
    %3 = vector.load %arg1[%c0_5, %c0_6] : memref<16x6xf32, #tpu.memory_space<vmem>>, vector<16x6xf32>
    %c0_7 = arith.constant 0 : index
    %c0_8 = arith.constant 0 : index
    %4 = vector.load %arg6[%c0_7, %c0_8] : memref<4x6xf32, #tpu.memory_space<vmem>>, vector<4x6xf32>
    %c0_9 = arith.constant 0 : index
    %c0_10 = arith.constant 0 : index
    %5 = vector.load %arg7[%c0_9, %c0_10] : memref<1x6xf32, #tpu.memory_space<vmem>>, vector<1x6xf32>
    %c0_11 = arith.constant 0 : index
    %c0_12 = arith.constant 0 : index
    %6 = vector.load %arg8[%c0_11, %c0_12] : memref<6x6xf32, #tpu.memory_space<vmem>>, vector<6x6xf32>
    %c0_13 = arith.constant 0 : index
    %c0_14 = arith.constant 0 : index
    %7 = vector.load %arg9[%c0_13, %c0_14] : memref<1x6xf32, #tpu.memory_space<vmem>>, vector<1x6xf32>
    %c0_15 = arith.constant 0 : index
    %c0_16 = arith.constant 0 : index
    %8 = vector.load %arg10[%c0_15, %c0_16] : memref<6x6xf32, #tpu.memory_space<vmem>>, vector<6x6xf32>
    %c0_17 = arith.constant 0 : index
    %c0_18 = arith.constant 0 : index
    %9 = vector.load %arg11[%c0_17, %c0_18] : memref<1x6xf32, #tpu.memory_space<vmem>>, vector<1x6xf32>
    %c0_19 = arith.constant 0 : index
    %c0_20 = arith.constant 0 : index
    %10 = vector.load %arg12[%c0_19, %c0_20] : memref<6x32xf32, #tpu.memory_space<vmem>>, vector<6x32xf32>
    %c0_21 = arith.constant 0 : index
    %c0_22 = arith.constant 0 : index
    %11 = vector.load %arg13[%c0_21, %c0_22] : memref<1x32xf32, #tpu.memory_space<vmem>>, vector<1x32xf32>
    %c0_23 = arith.constant 0 : index
    %12 = memref.load %arg0[%c0_23] : memref<6xf32, #tpu.memory_space<smem>>
    %cst = arith.constant dense<0.000000e+00> : vector<32x6xf32>
    %13 = tpu.matmul %0, %4, %cst {dimension_numbers = #tpu.dot_dimension_numbers<[1], [0], [0], [1], [0, 0, 1, 1], [], []>} : vector<32x4xf32>, vector<4x6xf32>, vector<32x6xf32> -> vector<32x6xf32>
    %14 = vector.broadcast %5 : vector<1x6xf32> to vector<32x6xf32>
    %15 = arith.addf %13, %14 : vector<32x6xf32>
    %cst_24 = arith.constant 0.000000e+00 : f32
    %16 = vector.broadcast %cst_24 : f32 to vector<32x6xf32>
    %17 = arith.maximumf %15, %16 : vector<32x6xf32>
    %cst_25 = arith.constant dense<0.000000e+00> : vector<32x6xf32>
    %18 = tpu.matmul %17, %6, %cst_25 {dimension_numbers = #tpu.dot_dimension_numbers<[1], [0], [0], [1], [0, 0, 1, 1], [], []>} : vector<32x6xf32>, vector<6x6xf32>, vector<32x6xf32> -> vector<32x6xf32>
    %19 = vector.broadcast %7 : vector<1x6xf32> to vector<32x6xf32>
    %20 = arith.addf %18, %19 : vector<32x6xf32>
    %21 = arith.truncf %3 : vector<16x6xf32> to vector<16x6xbf16>
    %cst_26 = arith.constant dense<0.000000e+00> : vector<32x6xf32>
    %22 = tpu.matmul %1, %21, %cst_26 {dimension_numbers = #tpu.dot_dimension_numbers<[1], [0], [0], [1], [0, 0, 1, 1], [], []>} : vector<32x16xbf16>, vector<16x6xbf16>, vector<32x6xf32> -> vector<32x6xf32>
    %23 = arith.addf %22, %20 : vector<32x6xf32>
    %cst_27 = arith.constant 0.000000e+00 : f32
    %24 = vector.broadcast %cst_27 : f32 to vector<32x6xf32>
    %25 = arith.maximumf %23, %24 : vector<32x6xf32>
    %26 = arith.truncf %25 : vector<32x6xf32> to vector<32x6xbf16>
    %cst_28 = arith.constant dense<0.000000e+00> : vector<16x6xf32>
    %27 = tpu.matmul %2, %26, %cst_28 {dimension_numbers = #tpu.dot_dimension_numbers<[1], [0], [0], [1], [0, 0, 1, 1], [], []>} : vector<16x32xbf16>, vector<32x6xbf16>, vector<16x6xf32> -> vector<16x6xf32>
    %cst_29 = arith.constant 1.000000e+00 : f32
    %28 = arith.addf %cst_29, %12 : f32
    %29 = vector.broadcast %28 : f32 to vector<16x6xf32>
    %30 = arith.mulf %29, %3 : vector<16x6xf32>
    %31 = arith.addf %30, %27 : vector<16x6xf32>
    %cst_30 = arith.constant dense<0.000000e+00> : vector<16x6xf32>
    %32 = tpu.matmul %31, %8, %cst_30 {dimension_numbers = #tpu.dot_dimension_numbers<[1], [0], [0], [1], [0, 0, 1, 1], [], []>} : vector<16x6xf32>, vector<6x6xf32>, vector<16x6xf32> -> vector<16x6xf32>
    %33 = vector.broadcast %9 : vector<1x6xf32> to vector<16x6xf32>
    %34 = arith.addf %32, %33 : vector<16x6xf32>
    %cst_31 = arith.constant 0.000000e+00 : f32
    %35 = vector.broadcast %cst_31 : f32 to vector<16x6xf32>
    %36 = arith.maximumf %34, %35 : vector<16x6xf32>
    %cst_32 = arith.constant dense<0.000000e+00> : vector<16x32xf32>
    %37 = tpu.matmul %36, %10, %cst_32 {dimension_numbers = #tpu.dot_dimension_numbers<[1], [0], [0], [1], [0, 0, 1, 1], [], []>} : vector<16x6xf32>, vector<6x32xf32>, vector<16x32xf32> -> vector<16x32xf32>
    %38 = vector.broadcast %11 : vector<1x32xf32> to vector<16x32xf32>
    %39 = arith.addf %37, %38 : vector<16x32xf32>
    %cst_33 = arith.constant 0.000000e+00 : f32
    %40 = vector.broadcast %cst_33 : f32 to vector<16x32xf32>
    %41 = arith.maximumf %39, %40 : vector<16x32xf32>
    %c0_i32 = arith.constant 0 : i32
    %c5_i32 = arith.constant 5 : i32
    %42 = arith.addi %c0_i32, %c5_i32 : i32
    %c1_i32 = arith.constant 1 : i32
    %43 = scf.for %arg33 = %c0_i32 to %42 step %c1_i32 iter_args(%arg34 = %41) -> (vector<16x32xf32>)  : i32 {
      %70 = arith.index_cast %arg33 : i32 to index
      %c0_66 = arith.constant 0 : index
      %c0_67 = arith.constant 0 : index
      %71 = vector.load %arg14[%70, %c0_66, %c0_67] : memref<5x4x32xf32, #tpu.memory_space<vmem>>, vector<1x4x32xf32>
      %72 = vector.shape_cast %71 : vector<1x4x32xf32> to vector<4x32xf32>
      %73 = arith.index_cast %arg33 : i32 to index
      %c0_68 = arith.constant 0 : index
      %c0_69 = arith.constant 0 : index
      %74 = vector.load %arg15[%73, %c0_68, %c0_69] : memref<5x1x32xf32, #tpu.memory_space<vmem>>, vector<1x1x32xf32>
      %75 = vector.shape_cast %74 : vector<1x1x32xf32> to vector<1x32xf32>
      %76 = arith.index_cast %arg33 : i32 to index
      %c0_70 = arith.constant 0 : index
      %c0_71 = arith.constant 0 : index
      %77 = vector.load %arg16[%76, %c0_70, %c0_71] : memref<5x32x32xf32, #tpu.memory_space<vmem>>, vector<1x32x32xf32>
      %78 = vector.shape_cast %77 : vector<1x32x32xf32> to vector<32x32xf32>
      %79 = arith.index_cast %arg33 : i32 to index
      %c0_72 = arith.constant 0 : index
      %c0_73 = arith.constant 0 : index
      %80 = vector.load %arg17[%79, %c0_72, %c0_73] : memref<5x1x32xf32, #tpu.memory_space<vmem>>, vector<1x1x32xf32>
      %81 = vector.shape_cast %80 : vector<1x1x32xf32> to vector<1x32xf32>
      %82 = arith.index_cast %arg33 : i32 to index
      %c0_74 = arith.constant 0 : index
      %c0_75 = arith.constant 0 : index
      %83 = vector.load %arg18[%82, %c0_74, %c0_75] : memref<5x32x32xf32, #tpu.memory_space<vmem>>, vector<1x32x32xf32>
      %84 = vector.shape_cast %83 : vector<1x32x32xf32> to vector<32x32xf32>
      %85 = arith.index_cast %arg33 : i32 to index
      %c0_76 = arith.constant 0 : index
      %c0_77 = arith.constant 0 : index
      %86 = vector.load %arg19[%85, %c0_76, %c0_77] : memref<5x1x32xf32, #tpu.memory_space<vmem>>, vector<1x1x32xf32>
      %87 = vector.shape_cast %86 : vector<1x1x32xf32> to vector<1x32xf32>
      %88 = arith.index_cast %arg33 : i32 to index
      %c0_78 = arith.constant 0 : index
      %c0_79 = arith.constant 0 : index
      %89 = vector.load %arg20[%88, %c0_78, %c0_79] : memref<5x32x32xf32, #tpu.memory_space<vmem>>, vector<1x32x32xf32>
      %90 = vector.shape_cast %89 : vector<1x32x32xf32> to vector<32x32xf32>
      %91 = arith.index_cast %arg33 : i32 to index
      %c0_80 = arith.constant 0 : index
      %c0_81 = arith.constant 0 : index
      %92 = vector.load %arg21[%91, %c0_80, %c0_81] : memref<5x1x32xf32, #tpu.memory_space<vmem>>, vector<1x1x32xf32>
      %93 = vector.shape_cast %92 : vector<1x1x32xf32> to vector<1x32xf32>
      %c1_i32_82 = arith.constant 1 : i32
      %94 = arith.addi %arg33, %c1_i32_82 : i32
      %95 = arith.index_cast %94 : i32 to index
      %96 = memref.load %arg0[%95] : memref<6xf32, #tpu.memory_space<smem>>
      %cst_83 = arith.constant dense<0.000000e+00> : vector<32x32xf32>
      %97 = tpu.matmul %0, %72, %cst_83 {dimension_numbers = #tpu.dot_dimension_numbers<[1], [0], [0], [1], [0, 0, 1, 1], [], []>} : vector<32x4xf32>, vector<4x32xf32>, vector<32x32xf32> -> vector<32x32xf32>
      %98 = vector.broadcast %75 : vector<1x32xf32> to vector<32x32xf32>
      %99 = arith.addf %97, %98 : vector<32x32xf32>
      %cst_84 = arith.constant 0.000000e+00 : f32
      %100 = vector.broadcast %cst_84 : f32 to vector<32x32xf32>
      %101 = arith.maximumf %99, %100 : vector<32x32xf32>
      %cst_85 = arith.constant dense<0.000000e+00> : vector<32x32xf32>
      %102 = tpu.matmul %101, %78, %cst_85 {dimension_numbers = #tpu.dot_dimension_numbers<[1], [0], [0], [1], [0, 0, 1, 1], [], []>} : vector<32x32xf32>, vector<32x32xf32>, vector<32x32xf32> -> vector<32x32xf32>
      %103 = vector.broadcast %81 : vector<1x32xf32> to vector<32x32xf32>
      %104 = arith.addf %102, %103 : vector<32x32xf32>
      %105 = arith.truncf %arg34 : vector<16x32xf32> to vector<16x32xbf16>
      %cst_86 = arith.constant dense<0.000000e+00> : vector<32x32xf32>
      %106 = tpu.matmul %1, %105, %cst_86 {dimension_numbers = #tpu.dot_dimension_numbers<[1], [0], [0], [1], [0, 0, 1, 1], [], []>} : vector<32x16xbf16>, vector<16x32xbf16>, vector<32x32xf32> -> vector<32x32xf32>
      %107 = arith.addf %106, %104 : vector<32x32xf32>
      %cst_87 = arith.constant 0.000000e+00 : f32
      %108 = vector.broadcast %cst_87 : f32 to vector<32x32xf32>
      %109 = arith.maximumf %107, %108 : vector<32x32xf32>
      %110 = arith.truncf %109 : vector<32x32xf32> to vector<32x32xbf16>
      %cst_88 = arith.constant dense<0.000000e+00> : vector<16x32xf32>
      %111 = tpu.matmul %2, %110, %cst_88 {dimension_numbers = #tpu.dot_dimension_numbers<[1], [0], [0], [1], [0, 0, 1, 1], [], []>} : vector<16x32xbf16>, vector<32x32xbf16>, vector<16x32xf32> -> vector<16x32xf32>
      %cst_89 = arith.constant 1.000000e+00 : f32
      %112 = arith.addf %cst_89, %96 : f32
      %113 = vector.broadcast %112 : f32 to vector<16x32xf32>
      %114 = arith.mulf %113, %arg34 : vector<16x32xf32>
      %115 = arith.addf %114, %111 : vector<16x32xf32>
      %cst_90 = arith.constant dense<0.000000e+00> : vector<16x32xf32>
      %116 = tpu.matmul %115, %84, %cst_90 {dimension_numbers = #tpu.dot_dimension_numbers<[1], [0], [0], [1], [0, 0, 1, 1], [], []>} : vector<16x32xf32>, vector<32x32xf32>, vector<16x32xf32> -> vector<16x32xf32>
      %117 = vector.broadcast %87 : vector<1x32xf32> to vector<16x32xf32>
      %118 = arith.addf %116, %117 : vector<16x32xf32>
      %cst_91 = arith.constant 0.000000e+00 : f32
      %119 = vector.broadcast %cst_91 : f32 to vector<16x32xf32>
      %120 = arith.maximumf %118, %119 : vector<16x32xf32>
      %cst_92 = arith.constant dense<0.000000e+00> : vector<16x32xf32>
      %121 = tpu.matmul %120, %90, %cst_92 {dimension_numbers = #tpu.dot_dimension_numbers<[1], [0], [0], [1], [0, 0, 1, 1], [], []>} : vector<16x32xf32>, vector<32x32xf32>, vector<16x32xf32> -> vector<16x32xf32>
      %122 = vector.broadcast %93 : vector<1x32xf32> to vector<16x32xf32>
      %123 = arith.addf %121, %122 : vector<16x32xf32>
      %cst_93 = arith.constant 0.000000e+00 : f32
      %124 = vector.broadcast %cst_93 : f32 to vector<16x32xf32>
      %125 = arith.maximumf %123, %124 : vector<16x32xf32>
      scf.yield %125 : vector<16x32xf32>
    }
    %c5_i32_34 = arith.constant 5 : i32
    %c0_35 = arith.constant 0 : index
    %c0_36 = arith.constant 0 : index
    %44 = vector.load %arg5[%c0_35, %c0_36] : memref<2x16xf32, #tpu.memory_space<vmem>>, vector<2x16xf32>
    %c0_37 = arith.constant 0 : index
    %c0_38 = arith.constant 0 : index
    %45 = vector.load %arg22[%c0_37, %c0_38] : memref<32x128xf32, #tpu.memory_space<vmem>>, vector<32x128xf32>
    %c0_39 = arith.constant 0 : index
    %c0_40 = arith.constant 0 : index
    %46 = vector.load %arg23[%c0_39, %c0_40] : memref<32x128xf32, #tpu.memory_space<vmem>>, vector<32x128xf32>
    %c0_41 = arith.constant 0 : index
    %c0_42 = arith.constant 0 : index
    %47 = vector.load %arg24[%c0_41, %c0_42] : memref<32x128xf32, #tpu.memory_space<vmem>>, vector<32x128xf32>
    %c0_43 = arith.constant 0 : index
    %c0_44 = arith.constant 0 : index
    %48 = vector.load %arg25[%c0_43, %c0_44] : memref<1x128xf32, #tpu.memory_space<vmem>>, vector<1x128xf32>
    %c0_45 = arith.constant 0 : index
    %c0_46 = arith.constant 0 : index
    %49 = vector.load %arg26[%c0_45, %c0_46] : memref<1x128xf32, #tpu.memory_space<vmem>>, vector<1x128xf32>
    %50 = arith.addf %48, %49 : vector<1x128xf32>
    %cst_47 = arith.constant 0.000000e+00 : f32
    %51 = vector.broadcast %cst_47 : f32 to vector<2x32xf32>
    %c0_i32_48 = arith.constant 0 : i32
    %c6_i32 = arith.constant 6 : i32
    %52 = arith.addi %c0_i32_48, %c6_i32 : i32
    %c1_i32_49 = arith.constant 1 : i32
    %53:4 = scf.for %arg33 = %c0_i32_48 to %52 step %c1_i32_49 iter_args(%arg34 = %51, %arg35 = %51, %arg36 = %51, %arg37 = %51) -> (vector<2x32xf32>, vector<2x32xf32>, vector<2x32xf32>, vector<2x32xf32>)  : i32 {
      %cst_66 = arith.constant dense<0.000000e+00> : vector<2x128xf32>
      %70 = tpu.matmul %arg36, %45, %cst_66 {dimension_numbers = #tpu.dot_dimension_numbers<[1], [0], [0], [1], [0, 0, 1, 1], [], []>} : vector<2x32xf32>, vector<32x128xf32>, vector<2x128xf32> -> vector<2x128xf32>
      %cst_67 = arith.constant dense<0.000000e+00> : vector<2x128xf32>
      %71 = tpu.matmul %arg37, %46, %cst_67 {dimension_numbers = #tpu.dot_dimension_numbers<[1], [0], [0], [1], [0, 0, 1, 1], [], []>} : vector<2x32xf32>, vector<32x128xf32>, vector<2x128xf32> -> vector<2x128xf32>
      %72 = arith.addf %70, %71 : vector<2x128xf32>
      %cst_68 = arith.constant dense<0.000000e+00> : vector<2x128xf32>
      %73 = tpu.matmul %arg34, %47, %cst_68 {dimension_numbers = #tpu.dot_dimension_numbers<[1], [0], [0], [1], [0, 0, 1, 1], [], []>} : vector<2x32xf32>, vector<32x128xf32>, vector<2x128xf32> -> vector<2x128xf32>
      %74 = arith.addf %72, %73 : vector<2x128xf32>
      %75 = vector.broadcast %50 : vector<1x128xf32> to vector<2x128xf32>
      %76 = arith.addf %74, %75 : vector<2x128xf32>
      %77 = vector.extract_strided_slice %76 {offsets = [0, 0], sizes = [2, 32], strides = [1, 1]} : vector<2x128xf32> to vector<2x32xf32>
      %78 = arith.negf %77 : vector<2x32xf32>
      %79 = math.exp %78 : vector<2x32xf32>
      %cst_69 = arith.constant 1.000000e+00 : f32
      %80 = vector.broadcast %cst_69 : f32 to vector<2x32xf32>
      %81 = arith.addf %80, %79 : vector<2x32xf32>
      %82 = arith.divf %80, %81 : vector<2x32xf32>
      %83 = vector.extract_strided_slice %76 {offsets = [0, 32], sizes = [2, 32], strides = [1, 1]} : vector<2x128xf32> to vector<2x32xf32>
      %84 = arith.negf %83 : vector<2x32xf32>
      %85 = math.exp %84 : vector<2x32xf32>
      %cst_70 = arith.constant 1.000000e+00 : f32
      %86 = vector.broadcast %cst_70 : f32 to vector<2x32xf32>
      %87 = arith.addf %86, %85 : vector<2x32xf32>
      %88 = arith.divf %86, %87 : vector<2x32xf32>
      %89 = vector.extract_strided_slice %76 {offsets = [0, 64], sizes = [2, 32], strides = [1, 1]} : vector<2x128xf32> to vector<2x32xf32>
      %90 = math.tanh %89 : vector<2x32xf32>
      %91 = vector.extract_strided_slice %76 {offsets = [0, 96], sizes = [2, 32], strides = [1, 1]} : vector<2x128xf32> to vector<2x32xf32>
      %92 = arith.negf %91 : vector<2x32xf32>
      %93 = math.exp %92 : vector<2x32xf32>
      %cst_71 = arith.constant 1.000000e+00 : f32
      %94 = vector.broadcast %cst_71 : f32 to vector<2x32xf32>
      %95 = arith.addf %94, %93 : vector<2x32xf32>
      %96 = arith.divf %94, %95 : vector<2x32xf32>
      %97 = arith.mulf %88, %arg35 : vector<2x32xf32>
      %98 = arith.mulf %82, %90 : vector<2x32xf32>
      %99 = arith.addf %97, %98 : vector<2x32xf32>
      %100 = math.tanh %99 : vector<2x32xf32>
      %101 = arith.mulf %96, %100 : vector<2x32xf32>
      %cst_72 = arith.constant dense<0.000000e+00> : vector<2x16xf32>
      %102 = tpu.matmul %101, %43, %cst_72 {dimension_numbers = #tpu.dot_dimension_numbers<[1], [1], [0], [0], [0, 0, 1, 0], [], []>} : vector<2x32xf32>, vector<16x32xf32>, vector<2x16xf32> -> vector<2x16xf32>
      %cst_73 = arith.constant 0.000000e+00 : f32
      %103 = vector.broadcast %cst_73 : f32 to vector<2x16xf32>
      %104 = arith.cmpf ogt, %44, %103 : vector<2x16xf32>
      %cst_74 = arith.constant -1.000000e+30 : f32
      %105 = vector.broadcast %cst_74 : f32 to vector<2x16xf32>
      %106 = arith.select %104, %102, %105 : vector<2x16xi1>, vector<2x16xf32>
      %cst_75 = arith.constant dense<0xFF800000> : vector<2xf32>
      %107 = vector.multi_reduction <maximumf>, %106, %cst_75 [1] : vector<2x16xf32> to vector<2xf32>
      %108 = vector.shape_cast %107 : vector<2xf32> to vector<2x1xf32>
      %109 = vector.broadcast %108 : vector<2x1xf32> to vector<2x16xf32>
      %110 = arith.subf %106, %109 : vector<2x16xf32>
      %111 = math.exp %110 : vector<2x16xf32>
      %cst_76 = arith.constant dense<0.000000e+00> : vector<2xf32>
      %112 = vector.multi_reduction <add>, %111, %cst_76 [1] : vector<2x16xf32> to vector<2xf32>
      %113 = vector.shape_cast %112 : vector<2xf32> to vector<2x1xf32>
      %cst_77 = arith.constant 1.000000e-30 : f32
      %114 = vector.broadcast %cst_77 : f32 to vector<2x1xf32>
      %115 = arith.maximumf %113, %114 : vector<2x1xf32>
      %116 = tpu.reciprocal %115 {approx = true} : vector<2x1xf32> -> vector<2x1xf32>
      %117 = vector.broadcast %116 : vector<2x1xf32> to vector<2x16xf32>
      %118 = arith.mulf %111, %117 : vector<2x16xf32>
      %cst_78 = arith.constant dense<0.000000e+00> : vector<2x32xf32>
      %119 = tpu.matmul %118, %43, %cst_78 {dimension_numbers = #tpu.dot_dimension_numbers<[1], [0], [0], [1], [0, 0, 1, 1], [], []>} : vector<2x16xf32>, vector<16x32xf32>, vector<2x32xf32> -> vector<2x32xf32>
      scf.yield %101, %99, %101, %119 : vector<2x32xf32>, vector<2x32xf32>, vector<2x32xf32>, vector<2x32xf32>
    }
    %c0_50 = arith.constant 0 : index
    %c0_51 = arith.constant 0 : index
    %54 = vector.load %arg27[%c0_50, %c0_51] : memref<32x32xf32, #tpu.memory_space<vmem>>, vector<32x32xf32>
    %cst_52 = arith.constant dense<0.000000e+00> : vector<2x32xf32>
    %55 = tpu.matmul %53#2, %54, %cst_52 {dimension_numbers = #tpu.dot_dimension_numbers<[1], [0], [0], [1], [0, 0, 1, 1], [], []>} : vector<2x32xf32>, vector<32x32xf32>, vector<2x32xf32> -> vector<2x32xf32>
    %c0_53 = arith.constant 0 : index
    %c0_54 = arith.constant 0 : index
    %56 = vector.load %arg28[%c0_53, %c0_54] : memref<32x32xf32, #tpu.memory_space<vmem>>, vector<32x32xf32>
    %cst_55 = arith.constant dense<0.000000e+00> : vector<2x32xf32>
    %57 = tpu.matmul %53#3, %56, %cst_55 {dimension_numbers = #tpu.dot_dimension_numbers<[1], [0], [0], [1], [0, 0, 1, 1], [], []>} : vector<2x32xf32>, vector<32x32xf32>, vector<2x32xf32> -> vector<2x32xf32>
    %58 = arith.addf %55, %57 : vector<2x32xf32>
    %c0_56 = arith.constant 0 : index
    %c0_57 = arith.constant 0 : index
    %59 = vector.load %arg29[%c0_56, %c0_57] : memref<1x32xf32, #tpu.memory_space<vmem>>, vector<1x32xf32>
    %60 = vector.broadcast %59 : vector<1x32xf32> to vector<2x32xf32>
    %61 = arith.addf %58, %60 : vector<2x32xf32>
    %cst_58 = arith.constant 0.000000e+00 : f32
    %62 = vector.broadcast %cst_58 : f32 to vector<2x32xf32>
    %63 = arith.maximumf %61, %62 : vector<2x32xf32>
    %c0_59 = arith.constant 0 : index
    %c0_60 = arith.constant 0 : index
    %64 = vector.load %arg30[%c0_59, %c0_60] : memref<32x12xf32, #tpu.memory_space<vmem>>, vector<32x12xf32>
    %cst_61 = arith.constant dense<0.000000e+00> : vector<2x12xf32>
    %65 = tpu.matmul %63, %64, %cst_61 {dimension_numbers = #tpu.dot_dimension_numbers<[1], [0], [0], [1], [0, 0, 1, 1], [], []>} : vector<2x32xf32>, vector<32x12xf32>, vector<2x12xf32> -> vector<2x12xf32>
    %c0_62 = arith.constant 0 : index
    %c0_63 = arith.constant 0 : index
    %66 = vector.load %arg31[%c0_62, %c0_63] : memref<1x12xf32, #tpu.memory_space<vmem>>, vector<1x12xf32>
    %67 = vector.broadcast %66 : vector<1x12xf32> to vector<2x12xf32>
    %68 = arith.addf %65, %67 : vector<2x12xf32>
    %c0_64 = arith.constant 0 : index
    %c0_65 = arith.constant 0 : index
    %69 = vector.load %arg32[%c0_64, %c0_65] : memref<2x12xf32, #tpu.memory_space<vmem>>, vector<2x12xf32>
    tpu.vector_store %arg32[%c0_64, %c0_65], %68 {strides = array<i32>} : memref<2x12xf32, #tpu.memory_space<vmem>>, vector<2x12xf32>,
    return
  }
}

</mosaic_0001>

<bundles_post_ra>
// kernel: tpu_custom_call.1
= control target key start
LH: loop header
LB: loop body
LE: loop exit
PB: predicated region body
PF: predicated region fallthrough
CT: control target
= control target key end

     0   :  { %s3351_s6 = smov 1   ;;  %s3352_s10 = smov 2   ;;  %s3915_s0 = inlined_call_operand.smem [shape: u32[33], index: -1, kind: input, shape index: {}] }
   0x1   :  { %s3431_s5 = sld [smem:[%s3915_s0]]   ;;  %s3353_s14 = smov 3  }
   0x2   :  { %s3436_s9 = sld [smem:[%s3915_s0 + %s3351_s6]]   ;;  %s3354_s18 = smov 4  }
   0x3   :  { %s3441_s13 = sld [smem:[%s3915_s0 + %s3352_s10]]   ;;  %s3355_s22 = smov 5  }
   0x4   :  { %s3446_s17 = sld [smem:[%s3915_s0 + %s3353_s14]]   ;;  %s3356_s26 = smov 6  }
   0x5   :  { %s3451_s21 = sld [smem:[%s3915_s0 + %s3354_s18]]   ;;  %s3357_s30 = smov 7  }
   0x6   :  { %s3456_s25 = sld [smem:[%s3915_s0 + %s3355_s22]]   ;;  %s3358_s4 = smov 8  }
   0x7   :  { %s3461_s29 = sld [smem:[%s3915_s0 + %s3356_s26]]   ;;  %s3359_s10 = smov 9  }
   0x8   :  { %3919 = sst [smem:[#allocation55_spill]] %s3436_s9  ;;  %s3360_s15 = smov 10  }
   0x9   :  { %3920 = sst [smem:[#allocation56_spill]] %s3441_s13  ;;  %s3361_s20 = smov 11  }
   0xa   :  { %3921 = sst [smem:[#allocation57_spill]] %s3446_s17  ;;  %s3362_s26 = smov 12  }
   0xb   :  { %s3466_s3 = sld [smem:[%s3915_s0 + %s3357_s30]]   ;;  %s3363_s1 = smov 13  }
   0xc   :  { %s3471_s8 = sld [smem:[%s3915_s0 + %s3358_s4]]   ;;  %s3364_s7 = smov 14  }
   0xd   :  { %s3476_s14 = sld [smem:[%s3915_s0 + %s3359_s10]]   ;;  %s3366_s22 = smov 16  }
   0xe   :  { %s3481_s19 = sld [smem:[%s3915_s0 + %s3360_s15]]   ;;  %s3365_s15 = smov 15  }
   0xf   :  { %s3486_s24 = sld [smem:[%s3915_s0 + %s3361_s20]]   ;;  %s3367_s28 = smov 17  }
  0x10   :  { %s3491_s30 = sld [smem:[%s3915_s0 + %s3362_s26]]  }
  0x11   :  { %s3496_s6 = sld [smem:[%s3915_s0 + %s3363_s1]]  }
  0x12   :  { %3922 = sst [smem:[#allocation58_spill]] %s3471_s8 }
  0x13   :  { %s3501_s12 = sld [smem:[%s3915_s0 + %s3364_s7]]   ;;  %s3368_s7 = smov 18  }
  0x14   :  { %3923 = sst [smem:[#allocation59_spill]] %s3481_s19 }
  0x15   :  { %s3506_s20 = sld [smem:[%s3915_s0 + %s3365_s15]]   ;;  %s3369_s15 = smov 19  }
  0x16   :  { %3924 = sst [smem:[#allocation60_spill]] %s3491_s30 }
  0x17   :  { %s3511_s27 = sld [smem:[%s3915_s0 + %s3366_s22]]   ;;  %s3370_s22 = smov 20  }
  0x18   :  { %s3516_s4 = sld [smem:[%s3915_s0 + %s3367_s28]]   ;;  %s3371_s28 = smov 21  }
  0x19   :  { %3925 = sst [smem:[#allocation61_spill]] %s3501_s12 }
  0x1a   :  { %s3521_s17 = sld [smem:[%s3915_s0 + %s3368_s7]]   ;;  %s3372_s7 = smov 22  }
  0x1b   :  { %s3526_s9 = sld [smem:[%s3915_s0 + %s3369_s15]]   ;;  %s3373_s15 = smov 23  }
  0x1c   :  { %s3536_s13 = sld [smem:[%s3915_s0 + %s3371_s28]]   ;;  %s3375_s28 = smov 25  }
  0x1d   :  { %3926 = sst [smem:[#allocation62_spill]] %s3511_s27 }
  0x1e   :  { %3927 = sst [smem:[#allocation63_spill]] %s3516_s4 }
  0x1f   :  { %s3531_s27 = sld [smem:[%s3915_s0 + %s3370_s22]]   ;;  %s3374_s22 = smov 24  }
  0x20   :  { %s3541_s4 = sld [smem:[%s3915_s0 + %s3372_s7]]   ;;  %s3376_s7 = smov 26  }
  0x21   :  { %3928 = sst [smem:[#allocation64_spill]] %s3526_s9 }
  0x22   :  { %3929 = sst [smem:[#allocation65_spill]] %s3536_s13 }
  0x23   :  { %s3546_s9 = sld [smem:[%s3915_s0 + %s3373_s15]]   ;;  %s3377_s15 = smov 27  }
  0x24   :  { %s3551_s12 = sld [smem:[%s3915_s0 + %s3374_s22]]   ;;  %s3378_s22 = smov 28  }
  0x25   :  { %s3556_s13 = sld [smem:[%s3915_s0 + %s3375_s28]]   ;;  %s3379_s28 = smov 29  }
  0x26   :  { %s3561_s30 = sld [smem:[%s3915_s0 + %s3376_s7]]   ;;  %s3380_s7 = smov 30  }
  0x27   :  { %s3571_s19 = sld [smem:[%s3915_s0 + %s3378_s22]]   ;;  %s3382_s22 = smov 32  }
  0x29   :  { %3930 = sst [smem:[#allocation66_spill]] %s3546_s9 }
  0x2a   :  { %s3566_s9 = sld [smem:[%s3915_s0 + %s3377_s15]]   ;;  %s3381_s15 = smov 31  }
  0x2b   :  { %3931 = sst [smem:[#allocation67_spill]] %s3556_s13 }
  0x2c   :  { %3932 = sst [smem:[#allocation68_spill]] %s3561_s30 }
  0x2d   :  { %3933 = sst [smem:[#allocation69_spill]] %s3571_s19 }
  0x2e   :  { %s3576_s13 = sld [smem:[%s3915_s0 + %s3379_s28]]  }
  0x2f   :  { %s3581_s30 = sld [smem:[%s3915_s0 + %s3380_s7]]  }
  0x30   :  { %s3586_s8 = sld [smem:[%s3915_s0 + %s3381_s15]]  }
  0x31   :  { %s3591_s19 = sld [smem:[%s3915_s0 + %s3382_s22]]  }
  0x32   :  { %70 = vsyncpa [#allocation5], 0 }
  0x33   :  { %71 = vsyncpa [#allocation3], 0 }
  0x34   :  { %72 = vsyncpa [#allocation8], 0 }
  0x35   :  { %73 = vsyncpa [#allocation11], 0 }
  0x36   :  { %74 = vsyncpa [#allocation14], 0 }
  0x37   :  { %75 = vsyncpa [#allocation17], 0 }
  0x38   :  { %76 = vsyncpa [#allocation20], 0 }
  0x39   :  { %77 = vsyncpa [#allocation23], 0 }
  0x3a   :  { %78 = vsyncpa [#allocation26], 0 }
  0x3b   :  { %79 = vsyncpa [#allocation29], 0 }
  0x3c   :  { %80 = vsyncpa [#allocation32], 0 }
  0x3d   :  { %81 = vsyncpa [#allocation35], 0 }
  0x3e   :  { %82 = vsyncpa [#allocation38], 0 }
  0x3f   :  { %83 = vsyncpa [#allocation4], 0  ;;  %s3383_s28 = smov [#allocation7]   ;;  %s3384_s2 = smov [#allocation10]  }
  0x40   :  { %s118_s1 = sshll.u32 %s3383_s28, 4  ;;  %s138_s7 = sshll.u32 %s3384_s2, 4  ;;  %s119_s1 = int_to_ptr.vmem [resolvable:$true] %s118_s1  ;;  %s139_s7 = int_to_ptr.vmem [resolvable:$true] %s138_s7 }
  0x41   :  { %s2783_s0 = scalar_lea.vmem %s119_s1, 32  ;;  %p2788_p1 = scmp.lt.s32.totalorder %s119_s1, %s119_s1 }
  0x42   :  { %p2784_p0 = scmp.ne.s32.totalorder %s119_s1, %s2783_s0  ;;  %p2789_p2 = scmp.lt.s32.totalorder %s2783_s0, %s2783_s0 }
  0x44   :  { %p2790_p3 = por %p2789_p2, %p2788_p1 }
  0x46   :  { %p2791_p4 = pnand %p2790_p3, %p2784_p0 }
  0x48   :  { %2794 = shalt.err (!%p2791_p4)
}
  0x49   :  { %121 = dma.hbm_to_vmem [thread:$0]  %s3456_s25, 32, %s119_s1, [#allocation8]  }
  0x4a   :  { %s2803_s10 = scalar_lea.vmem %s139_s7, 16  ;;  %s2807_s11 = scalar_lea.vmem %s139_s7, 32 }
  0x4b   :  { %p2804_p5 = scmp.ne.s32.totalorder %s139_s7, %s2803_s10  ;;  %p2808_p6 = scmp.lt.s32.totalorder %s139_s7, %s139_s7 }
  0x4c   :  { %p2809_p7 = scmp.lt.s32.totalorder %s2807_s11, %s2803_s10 }
  0x4e   :  { %p2810_p8 = por %p2809_p7, %p2808_p6 }
  0x50   :  { %p2811_p9 = pnand %p2810_p8, %p2804_p5 }
  0x52   :  { %2814 = shalt.err (!%p2811_p9)
}
  0x53   :  { %141 = dma.hbm_to_vmem [thread:$0]  %s3466_s3, 16, %s139_s7, [#allocation11]  }
  0x54   :  { %s3385_s15 = smov [#allocation13]   ;;  %s3386_s18 = smov [#allocation16]  }
  0x55   :  { %s158_s16 = sshll.u32 %s3385_s15, 4  ;;  %s178_s22 = sshll.u32 %s3386_s18, 4  ;;  %s159_s16 = int_to_ptr.vmem [resolvable:$true] %s158_s16  ;;  %s179_s22 = int_to_ptr.vmem [resolvable:$true] %s178_s22 }
  0x56   :  { %s2823_s23 = scalar_lea.vmem %s159_s16, 16  ;;  %s2827_s26 = scalar_lea.vmem %s159_s16, 32 }
  0x57   :  { %p2824_p10 = scmp.ne.s32.totalorder %s159_s16, %s2823_s23  ;;  %p2828_p11 = scmp.lt.s32.totalorder %s159_s16, %s159_s16 }
  0x58   :  { %p2829_p12 = scmp.lt.s32.totalorder %s2827_s26, %s2823_s23 }
  0x5a   :  { %p2830_p13 = por %p2829_p12, %p2828_p11 }
  0x5c   :  { %p2831_p0 = pnand %p2830_p13, %p2824_p10 }
  0x5e   :  { %2834 = shalt.err (!%p2831_p0)
}
  0x5f   :  { %161 = dma.hbm_to_vmem [thread:$0]  %s3476_s14, 16, %s159_s16, [#allocation14]  }
  0x60   :  { %s2843_s25 = scalar_lea.vmem %s179_s22, 16  ;;  %s2847_s28 = scalar_lea.vmem %s179_s22, 32 }
  0x61   :  { %p2844_p1 = scmp.ne.s32.totalorder %s179_s22, %s2843_s25  ;;  %p2848_p2 = scmp.lt.s32.totalorder %s179_s22, %s179_s22 }
  0x62   :  { %p2849_p3 = scmp.lt.s32.totalorder %s2847_s28, %s2843_s25 }
  0x64   :  { %p2850_p4 = por %p2849_p3, %p2848_p2 }
  0x66   :  { %p2851_p5 = pnand %p2850_p4, %p2844_p1 }
  0x68   :  { %2854 = shalt.err (!%p2851_p5)
}
  0x69   :  { %181 = dma.hbm_to_vmem [thread:$0]  %s3486_s24, 16, %s179_s22, [#allocation17]  }
  0x6a   :  { %s3387_s3 = smov [#allocation19]   ;;  %s3388_s2 = smov [#allocation22]  }
  0x6b   :  { %s198_s1 = sshll.u32 %s3387_s3, 4  ;;  %s219_s7 = sshll.u32 %s3388_s2, 4  ;;  %s199_s1 = int_to_ptr.vmem [resolvable:$true] %s198_s1  ;;  %s220_s7 = int_to_ptr.vmem [resolvable:$true] %s219_s7 }
  0x6c   :  { %s2863_s0 = scalar_lea.vmem %s199_s1, 16  ;;  %s2867_s10 = scalar_lea.vmem %s199_s1, 32 }
  0x6d   :  { %p2864_p6 = scmp.ne.s32.totalorder %s199_s1, %s2863_s0  ;;  %p2868_p7 = scmp.lt.s32.totalorder %s199_s1, %s199_s1 }
  0x6e   :  { %p2869_p8 = scmp.lt.s32.totalorder %s2867_s10, %s2863_s0 }
  0x70   :  { %p2870_p9 = por %p2869_p8, %p2868_p7 }
  0x72   :  { %p2871_p10 = pnand %p2870_p9, %p2864_p6 }
  0x74   :  { %2874 = shalt.err (!%p2871_p10)
}
  0x75   :  { %201 = dma.hbm_to_vmem [thread:$0]  %s3496_s6, 16, %s199_s1, [#allocation20]  }
  0x76   :  { %s2883_s14 = scalar_lea.vmem %s220_s7, 80  ;;  %s2887_s11 = scalar_lea.vmem %s220_s7, 96 }
  0x77   :  { %p2884_p11 = scmp.ne.s32.totalorder %s220_s7, %s2883_s14  ;;  %p2888_p12 = scmp.lt.s32.totalorder %s220_s7, %s220_s7 }
  0x78   :  { %p2889_p13 = scmp.lt.s32.totalorder %s2887_s11, %s2883_s14 }
  0x7a   :  { %p2890_p0 = por %p2889_p13, %p2888_p12 }
  0x7c   :  { %p2891_p1 = pnand %p2890_p0, %p2884_p11 }
  0x7e   :  { %2894 = shalt.err (!%p2891_p1)
}
  0x7f   :  { %s3389_s24 = smov 16   ;;  %s3390_s15 = smov 1  }
  0x80   :  { %225 = dma.hbm_to_vmem [thread:$0]  %s3506_s20, 80, %s220_s7, [#allocation23], %s3389_s24, %s3389_s24, %s3390_s15  }
  0x81   :  { %s3391_s16 = smov [#allocation25]  }
  0x82   :  { %s245_s18 = sshll.u32 %s3391_s16, 4  ;;  %s246_s18 = int_to_ptr.vmem [resolvable:$true] %s245_s18 }
  0x83   :  { %s2903_s22 = scalar_lea.vmem %s246_s18, 2560  ;;  %p2908_p3 = scmp.lt.s32.totalorder %s246_s18, %s246_s18 }
  0x84   :  { %p2904_p2 = scmp.ne.s32.totalorder %s246_s18, %s2903_s22  ;;  %p2909_p4 = scmp.lt.s32.totalorder %s2903_s22, %s2903_s22 }
  0x86   :  { %p2910_p5 = por %p2909_p4, %p2908_p3 }
  0x88   :  { %p2911_p6 = pnand %p2910_p5, %p2904_p2 }
  0x8a   :  { %2914 = shalt.err (!%p2911_p6)
}
  0x8b   :  { %s3392_s6 = smov 128   ;;  %s3393_s23 = smov 8  }
  0x8c   :  { %251 = dma.hbm_to_vmem [thread:$0]  %s3521_s17, 2560, %s246_s18, [#allocation26], %s3392_s6, %s3392_s6, %s3393_s23  }
  0x8d   :  { %s3394_s26 = smov [#allocation28]   ;;  %s3395_s20 = smov [#allocation31]  }
  0x8e   :  { %s269_s25 = sshll.u32 %s3394_s26, 4  ;;  %s293_s28 = sshll.u32 %s3395_s20, 4  ;;  %s270_s25 = int_to_ptr.vmem [resolvable:$true] %s269_s25  ;;  %s294_s28 = int_to_ptr.vmem [resolvable:$true] %s293_s28 }
  0x8f   :  { %s2923_s3 = scalar_lea.vmem %s270_s25, 2560  ;;  %p2928_p8 = scmp.lt.s32.totalorder %s270_s25, %s270_s25 }
  0x90   :  { %p2924_p7 = scmp.ne.s32.totalorder %s270_s25, %s2923_s3  ;;  %p2929_p9 = scmp.lt.s32.totalorder %s2923_s3, %s2923_s3 }
  0x92   :  { %p2930_p10 = por %p2929_p9, %p2928_p8 }
  0x94   :  { %p2931_p11 = pnand %p2930_p10, %p2924_p7 }
  0x96   :  { %2934 = shalt.err (!%p2931_p11)
}
  0x97   :  { %275 = dma.hbm_to_vmem [thread:$0]  %s3531_s27, 2560, %s270_s25, [#allocation29], %s3392_s6, %s3392_s6, %s3393_s23  }
  0x98   :  { %s2943_s1 = scalar_lea.vmem %s294_s28, 512  ;;  %p2948_p13 = scmp.lt.s32.totalorder %s294_s28, %s294_s28 }
  0x99   :  { %p2944_p12 = scmp.ne.s32.totalorder %s294_s28, %s2943_s1  ;;  %p2949_p0 = scmp.lt.s32.totalorder %s2943_s1, %s2943_s1 }
  0x9b   :  { %p2950_p1 = por %p2949_p0, %p2948_p13 }
  0x9d   :  { %p2951_p2 = pnand %p2950_p1, %p2944_p12 }
  0x9f   :  { %2954 = shalt.err (!%p2951_p2)
}
  0xa0   :  { %299 = dma.hbm_to_vmem [thread:$0]  %s3541_s4, 512, %s294_s28, [#allocation32], %s3392_s6, %s3392_s6, %s3393_s23  }
  0xa1   :  { %s3396_s17 = smov [#allocation34]   ;;  %s3397_s7 = smov [#allocation37]  }
  0xa2   :  { %s317_s2 = sshll.u32 %s3396_s17, 4  ;;  %s341_s0 = sshll.u32 %s3397_s7, 4  ;;  %s318_s2 = int_to_ptr.vmem [resolvable:$true] %s317_s2  ;;  %s342_s0 = int_to_ptr.vmem [resolvable:$true] %s341_s0 }
  0xa3   :  { %s2963_s10 = scalar_lea.vmem %s318_s2, 512  ;;  %p2968_p4 = scmp.lt.s32.totalorder %s318_s2, %s318_s2 }
  0xa4   :  { %p2964_p3 = scmp.ne.s32.totalorder %s318_s2, %s2963_s10  ;;  %p2969_p5 = scmp.lt.s32.totalorder %s2963_s10, %s2963_s10 }
  0xa6   :  { %p2970_p6 = por %p2969_p5, %p2968_p4 }
  0xa8   :  { %p2971_p7 = pnand %p2970_p6, %p2964_p3 }
  0xaa   :  { %2974 = shalt.err (!%p2971_p7)
}
  0xab   :  { %323 = dma.hbm_to_vmem [thread:$0]  %s3551_s12, 512, %s318_s2, [#allocation35], %s3392_s6, %s3392_s6, %s3393_s23  }
  0xac   :  { %s90_s27 = sshll.u32 %s3431_s5, 4  ;;  %s2983_s4 = scalar_lea.vmem %s342_s0, 512  ;;  %s91_s27 = int_to_ptr.vmem [resolvable:$true] %s90_s27 }
  0xad   :  { %p2984_p8 = scmp.ne.s32.totalorder %s342_s0, %s2983_s4  ;;  %p2988_p9 = scmp.lt.s32.totalorder %s342_s0, %s342_s0 }
  0xae   :  { %p2989_p10 = scmp.lt.s32.totalorder %s2983_s4, %s2983_s4 }
  0xb0   :  { %p2990_p11 = por %p2989_p10, %p2988_p9 }
  0xb2   :  { %p2991_p12 = pnand %p2990_p11, %p2984_p8 }
  0xb4   :  { %2994 = shalt.err (!%p2991_p12)
}
  0xb5   :  { %347 = dma.hbm_to_vmem [thread:$0]  %s3566_s9, 512, %s342_s0, [#allocation38], %s3392_s6, %s3392_s6, %s3393_s23  }
  0xb6   :  { %s2995_s14 = scalar_lea.vmem %s91_s27, 16  ;;  %p3000_p0 = scmp.lt.s32.totalorder %s91_s27, %s91_s27 }
  0xb7   :  { %p2996_p13 = scmp.ne.s32.totalorder %s91_s27, %s2995_s14  ;;  %p3001_p1 = scmp.lt.s32.totalorder %s2995_s14, %s2995_s14 }
  0xb9   :  { %p3002_p2 = por %p3001_p1, %p3000_p0 }
  0xbb   :  { %p3003_p3 = pnand %p3002_p2, %p2996_p13 }
  0xbd   :  { %3006 = shalt.err (!%p3003_p3)
}
  0xbe   :  { %s3398_s5 = smov [#allocation2]   ;;  %s3399_s12 = smov [#allocation6]  }
  0xbf   :  { %93 = dma.vmem_to_smem %s91_s27, 16, %s3398_s5, [#allocation5]  }
  0xc0   :  { %s105_s11 = sshll.u32 %s3399_s12, 4  ;;  %s106_s11 = int_to_ptr.vmem [resolvable:$true] %s105_s11 }
  0xc1   :  { %s3015_s16 = scalar_lea.vmem %s106_s11, 128  ;;  %p3020_p5 = scmp.lt.s32.totalorder %s106_s11, %s106_s11 }
  0xc2   :  { %p3016_p4 = scmp.ne.s32.totalorder %s106_s11, %s3015_s16  ;;  %p3021_p6 = scmp.lt.s32.totalorder %s3015_s16, %s3015_s16 }
  0xc4   :  { %p3022_p7 = por %p3021_p6, %p3020_p5 }
  0xc6   :  { %p3023_p8 = pnand %p3022_p7, %p3016_p4 }
  0xc8   :  { %3026 = shalt.err (!%p3023_p8)
}
  0xc9   :  { %s3400_s9 = smov 64   ;;  %s3401_s18 = smov 4  }
  0xca   :  { %111 = dma.hbm_to_vmem [thread:$0]  %s3451_s21, 128, %s106_s11, [#allocation3], %s3400_s9, %s3400_s9, %s3401_s18  }
  0xcb   :  { %s3402_s22 = smov [#allocation9]   ;;  %s3403_s25 = smov [#allocation12]  }
  0xcc   :  { %s128_s26 = sshll.u32 %s3402_s22, 4  ;;  %s148_s20 = sshll.u32 %s3403_s25, 4  ;;  %s129_s26 = int_to_ptr.vmem [resolvable:$true] %s128_s26  ;;  %s149_s20 = int_to_ptr.vmem [resolvable:$true] %s148_s20 }
  0xcd   :  { %s3035_s28 = scalar_lea.vmem %s129_s26, 64  ;;  %p3040_p10 = scmp.lt.s32.totalorder %s129_s26, %s129_s26 }
  0xce   :  { %p3036_p9 = scmp.ne.s32.totalorder %s129_s26, %s3035_s28  ;;  %p3041_p11 = scmp.lt.s32.totalorder %s3035_s28, %s3035_s28 }
  0xd0   :  { %p3042_p12 = por %p3041_p11, %p3040_p10 }
  0xd2   :  { %p3043_p13 = pnand %p3042_p12, %p3036_p9 }
  0xd4   :  { %3046 = shalt.err (!%p3043_p13)
}
  0xd5   :  { %131 = dma.hbm_to_vmem [thread:$0]  %s3461_s29, 64, %s129_s26, [#allocation8]  }
  0xd6   :  { %s3055_s3 = scalar_lea.vmem %s149_s20, 128  ;;  %p3060_p1 = scmp.lt.s32.totalorder %s149_s20, %s149_s20 }
  0xd7   :  { %p3056_p0 = scmp.ne.s32.totalorder %s149_s20, %s3055_s3  ;;  %p3061_p2 = scmp.lt.s32.totalorder %s3055_s3, %s3055_s3 }
  0xd9   :  { %p3062_p3 = por %p3061_p2, %p3060_p1 }
  0xdb   :  { %p3063_p4 = pnand %p3062_p3, %p3056_p0 }
  0xdd   :  { %3066 = shalt.err (!%p3063_p4)
}
  0xde   :  { %s3934_s21 = sld [smem:[#allocation58_spill]]  ;;  %s3404_s1 = smov [#allocation15]  }
  0xdf   :  { %s168_s17 = sshll.u32 %s3404_s1, 4  ;;  %s3405_s2 = smov [#allocation18]   ;;  %s169_s17 = int_to_ptr.vmem [resolvable:$true] %s168_s17 }
  0xe0   :  { %s188_s7 = sshll.u32 %s3405_s2, 4  ;;  %s3075_s0 = scalar_lea.vmem %s169_s17, 128  ;;  %s189_s7 = int_to_ptr.vmem [resolvable:$true] %s188_s7 }
  0xe1   :  { %p3076_p5 = scmp.ne.s32.totalorder %s169_s17, %s3075_s0  ;;  %p3080_p6 = scmp.lt.s32.totalorder %s169_s17, %s169_s17 }
  0xe2   :  { %p3081_p7 = scmp.lt.s32.totalorder %s3075_s0, %s3075_s0 }
  0xe4   :  { %151 = dma.hbm_to_vmem [thread:$0]  %s3934_s21, 128, %s149_s20, [#allocation11]  }
  0xe5   :  { %p3082_p8 = por %p3081_p7, %p3080_p6 }
  0xe7   :  { %p3083_p9 = pnand %p3082_p8, %p3076_p5 }
  0xe9   :  { %3086 = shalt.err (!%p3083_p9)
}
  0xea   :  { %s3935_s29 = sld [smem:[#allocation59_spill]]  ;;  %s3095_s10 = scalar_lea.vmem %s189_s7, 128 }
  0xeb   :  { %p3096_p10 = scmp.ne.s32.totalorder %s189_s7, %s3095_s10  ;;  %p3100_p11 = scmp.lt.s32.totalorder %s189_s7, %s189_s7 }
  0xec   :  { %p3101_p12 = scmp.lt.s32.totalorder %s3095_s10, %s3095_s10 }
  0xee   :  { %p3102_p13 = por %p3101_p12, %p3100_p11 }
  0xf0   :  { %171 = dma.hbm_to_vmem [thread:$0]  %s3935_s29, 128, %s169_s17, [#allocation14]  }
  0xf1   :  { %p3103_p0 = pnand %p3102_p13, %p3096_p10 }
  0xf3   :  { %3106 = shalt.err (!%p3103_p0)
}
  0xf4   :  { %s3936_s27 = sld [smem:[#allocation60_spill]]  ;;  %s3406_s4 = smov [#allocation21]  }
  0xf5   :  { %s207_s14 = sshll.u32 %s3406_s4, 4  ;;  %s3407_s5 = smov [#allocation24]   ;;  %s208_s14 = int_to_ptr.vmem [resolvable:$true] %s207_s14 }
  0xf6   :  { %s233_s12 = sshll.u32 %s3407_s5, 4  ;;  %s3115_s11 = scalar_lea.vmem %s208_s14, 320  ;;  %s234_s12 = int_to_ptr.vmem [resolvable:$true] %s233_s12 }
  0xf7   :  { %p3116_p1 = scmp.ne.s32.totalorder %s208_s14, %s3115_s11  ;;  %p3120_p2 = scmp.lt.s32.totalorder %s208_s14, %s208_s14 }
  0xf8   :  { %p3121_p3 = scmp.lt.s32.totalorder %s3115_s11, %s3115_s11 }
  0xfa   :  { %191 = dma.hbm_to_vmem [thread:$0]  %s3936_s27, 128, %s189_s7, [#allocation17]  }
  0xfb   :  { %p3122_p4 = por %p3121_p3, %p3120_p2 }
  0xfd   :  { %p3123_p5 = pnand %p3122_p4, %p3116_p1 }
  0xff   :  { %3126 = shalt.err (!%p3123_p5)
}
 0x100   :  { %s3937_s16 = sld [smem:[#allocation61_spill]]  ;;  %s3135_s22 = scalar_lea.vmem %s234_s12, 80 }
 0x101   :  { %p3136_p6 = scmp.ne.s32.totalorder %s234_s12, %s3135_s22  ;;  %s3139_s26 = scalar_lea.vmem %s234_s12, 96 }
 0x102   :  { %p3140_p7 = scmp.lt.s32.totalorder %s234_s12, %s234_s12  ;;  %p3141_p8 = scmp.lt.s32.totalorder %s3139_s26, %s3135_s22 }
 0x104   :  { %p3142_p9 = por %p3141_p8, %p3140_p7 }
 0x106   :  { %213 = dma.hbm_to_vmem [thread:$0]  %s3937_s16, 320, %s208_s14, [#allocation20], %s3400_s9, %s3400_s9, %s3401_s18  }
 0x107   :  { %p3143_p10 = pnand %p3142_p9, %p3136_p6 }
 0x109   :  { %3146 = shalt.err (!%p3143_p10)
}
 0x10a   :  { %s3938_s25 = sld [smem:[#allocation63_spill]]  ;;  %s3408_s20 = smov [#allocation27]  }
 0x10b   :  { %s257_s28 = sshll.u32 %s3408_s20, 4  ;;  %s3409_s3 = smov [#allocation30]   ;;  %s258_s28 = int_to_ptr.vmem [resolvable:$true] %s257_s28 }
 0x10c   :  { %s281_s21 = sshll.u32 %s3409_s3, 4  ;;  %s3155_s9 = scalar_lea.vmem %s258_s28, 80  ;;  %s282_s21 = int_to_ptr.vmem [resolvable:$true] %s281_s21 }
 0x10d   :  { %p3156_p11 = scmp.ne.s32.totalorder %s258_s28, %s3155_s9  ;;  %s3159_s18 = scalar_lea.vmem %s258_s28, 96 }
 0x10e   :  { %p3160_p12 = scmp.lt.s32.totalorder %s258_s28, %s258_s28  ;;  %p3161_p13 = scmp.lt.s32.totalorder %s3159_s18, %s3155_s9 }
 0x110   :  { %239 = dma.hbm_to_vmem [thread:$0]  %s3938_s25, 80, %s234_s12, [#allocation23], %s3389_s24, %s3389_s24, %s3390_s15  }
 0x111   :  { %p3162_p0 = por %p3161_p13, %p3160_p12 }
 0x113   :  { %p3163_p1 = pnand %p3162_p0, %p3156_p11 }
 0x115   :  { %3166 = shalt.err (!%p3163_p1)
}
 0x116   :  { %s3939_s1 = sld [smem:[#allocation64_spill]]  ;;  %s3175_s17 = scalar_lea.vmem %s282_s21, 80 }
 0x117   :  { %p3176_p2 = scmp.ne.s32.totalorder %s282_s21, %s3175_s17  ;;  %s3179_s2 = scalar_lea.vmem %s282_s21, 96 }
 0x118   :  { %p3180_p3 = scmp.lt.s32.totalorder %s282_s21, %s282_s21  ;;  %p3181_p4 = scmp.lt.s32.totalorder %s3179_s2, %s3175_s17 }
 0x11a   :  { %p3182_p5 = por %p3181_p4, %p3180_p3 }
 0x11c   :  { %263 = dma.hbm_to_vmem [thread:$0]  %s3939_s1, 80, %s258_s28, [#allocation26], %s3389_s24, %s3389_s24, %s3390_s15  }
 0x11d   :  { %p3183_p6 = pnand %p3182_p5, %p3176_p2 }
 0x11f   :  { %3186 = shalt.err (!%p3183_p6)
}
 0x120   :  { %s3940_s7 = sld [smem:[#allocation65_spill]]  ;;  %s3410_s0 = smov [#allocation33]  }
 0x121   :  { %s305_s29 = sshll.u32 %s3410_s0, 4  ;;  %s3411_s10 = smov [#allocation36]   ;;  %s306_s29 = int_to_ptr.vmem [resolvable:$true] %s305_s29 }
 0x122   :  { %s330_s27 = sshll.u32 %s3411_s10, 4  ;;  %s3195_s4 = scalar_lea.vmem %s306_s29, 512  ;;  %s331_s27 = int_to_ptr.vmem [resolvable:$true] %s330_s27 }
 0x123   :  { %p3196_p7 = scmp.ne.s32.totalorder %s306_s29, %s3195_s4  ;;  %p3200_p8 = scmp.lt.s32.totalorder %s306_s29, %s306_s29 }
 0x124   :  { %p3201_p9 = scmp.lt.s32.totalorder %s3195_s4, %s3195_s4 }
 0x126   :  { %287 = dma.hbm_to_vmem [thread:$0]  %s3940_s7, 80, %s282_s21, [#allocation29], %s3389_s24, %s3389_s24, %s3390_s15  }
 0x127   :  { %p3202_p10 = por %p3201_p9, %p3200_p8 }
 0x129   :  { %p3203_p11 = pnand %p3202_p10, %p3196_p7 }
 0x12b   :  { %3206 = shalt.err (!%p3203_p11)
}
 0x12c   :  { %s3941_s14 = sld [smem:[#allocation66_spill]]  ;;  %s3215_s5 = scalar_lea.vmem %s331_s27, 16 }
 0x12d   :  { %p3216_p12 = scmp.ne.s32.totalorder %s331_s27, %s3215_s5  ;;  %s3219_s24 = scalar_lea.vmem %s331_s27, 32 }
 0x12e   :  { %p3220_p13 = scmp.lt.s32.totalorder %s331_s27, %s331_s27  ;;  %p3221_p0 = scmp.lt.s32.totalorder %s3219_s24, %s3215_s5 }
 0x130   :  { %p3222_p1 = por %p3221_p0, %p3220_p13 }
 0x132   :  { %311 = dma.hbm_to_vmem [thread:$0]  %s3941_s14, 512, %s306_s29, [#allocation32], %s3392_s6, %s3392_s6, %s3393_s23  }
 0x133   :  { %p3223_p2 = pnand %p3222_p1, %p3216_p12 }
 0x135   :  { %3226 = shalt.err (!%p3223_p2)
}
 0x136   :  { %s3942_s15 = sld [smem:[#allocation67_spill]]  ;;  %s3412_s12 = smov [#allocation39]  }
 0x137   :  { %s353_s11 = sshll.u32 %s3412_s12, 4  ;;  %s354_s11 = int_to_ptr.vmem [resolvable:$true] %s353_s11 }
 0x138   :  { %s3235_s16 = scalar_lea.vmem %s354_s11, 512  ;;  %p3240_p4 = scmp.lt.s32.totalorder %s354_s11, %s354_s11 }
 0x139   :  { %p3236_p3 = scmp.ne.s32.totalorder %s354_s11, %s3235_s16  ;;  %p3241_p5 = scmp.lt.s32.totalorder %s3235_s16, %s3235_s16 }
 0x13b   :  { %p3242_p6 = por %p3241_p5, %p3240_p4 }
 0x13c   :  { %333 = dma.hbm_to_vmem [thread:$0]  %s3942_s15, 16, %s331_s27, [#allocation35]  }
 0x13d   :  { %p3243_p7 = pnand %p3242_p6, %p3236_p3 }
 0x13f   :  { %3246 = shalt.err (!%p3243_p7)
}
 0x140   :  { %s3943_s22 = sld [smem:[#allocation69_spill]] }
 0x146   :  { %359 = dma.hbm_to_vmem [thread:$0]  %s3943_s22, 512, %s354_s11, [#allocation38], %s3392_s6, %s3392_s6, %s3393_s23  }
 0x147   :  { %3295 = dma.done.wait [#allocation5], 16  }
 0x148   :  { %3296 = vsyncadd [#allocation5], 4294967280 }
 0x149   :  { %3297 = dma.done.wait [#allocation3], 128  }
 0x14a   :  { %3298 = vsyncadd [#allocation3], 4294967168 }
 0x14b   :  { %3299 = dma.done.wait [#allocation8], 96  }
 0x14c   :  { %3300 = vsyncadd [#allocation8], 4294967200 }
 0x14d   :  { %3301 = dma.done.wait [#allocation11], 144  }
 0x14e   :  { %3302 = vsyncadd [#allocation11], 4294967152 }
 0x14f   :  { %3303 = dma.done.wait [#allocation14], 144  }
 0x150   :  { %3304 = vsyncadd [#allocation14], 4294967152 }
 0x151   :  { %3305 = dma.done.wait [#allocation17], 144  }
 0x152   :  { %3306 = vsyncadd [#allocation17], 4294967152 }
 0x153   :  { %3307 = dma.done.wait [#allocation20], 336  }
 0x154   :  { %3308 = vsyncadd [#allocation20], 4294966960 }
 0x155   :  { %3309 = dma.done.wait [#allocation23], 160  }
 0x156   :  { %3310 = vsyncadd [#allocation23], 4294967136 }
 0x157   :  { %3311 = dma.done.wait [#allocation26], 2640  }
 0x158   :  { %3312 = vsyncadd [#allocation26], 4294964656 }
 0x159   :  { %3313 = dma.done.wait [#allocation29], 2640  }
 0x15a   :  { %3314 = vsyncadd [#allocation29], 4294964656 }
 0x15b   :  { %3315 = dma.done.wait [#allocation32], 1024  }
 0x15c   :  { %3316 = vsyncadd [#allocation32], 4294966272 }
 0x15d   :  { %3317 = dma.done.wait [#allocation35], 528  }
 0x15e   :  { %3318 = vsyncadd [#allocation35], 4294966768 }
 0x15f   :  { %3319 = dma.done.wait [#allocation38], 1024  }
 0x160   :  { %3320 = vsyncadd [#allocation38], 4294966272 }
 0x161   :  { %438 = sfence }
 0x162   :  { %v452_v0 = vld [vmem:[#allocation9] sm:$0xf]  ;;  %s3944_s6 = sld [smem:[#allocation56_spill]]  ;;  %vm480_vm0 = vcmask 1043456   ;;  %vm467_vm1 = vcmask 31744   ;;  %vm692_vm2 = vcmask 130048  }
 0x163   :  { %s3945_s23 = sld [smem:[#allocation55_spill]]  ;;  %2454 = vmatprep.subr.msk.mxu0 %vm480_vm0, %v452_v0  ;;  %v454_v10 = vld [vmem:[#allocation12] sm:$0x3f]  ;;  %vm592_vm3 = vcmask 1045504   ;;  %v2304_v11 = vld [vmem:[#allocation10] ss:$0 sm:$0xff] }
 0x164   :  { %s3946_s26 = sld [smem:[#allocation57_spill]]  ;;  %2455 = vmatpush3.msk.msra.mxu0 %vm480_vm0, %v452_v0  ;;  %2462 = vmatprep.subr.msk.mxu1 %vm592_vm3, %v454_v10  ;;  %vm579_vm4 = vcmask 48128   ;;  %v3413_v24 = vmov 0.0   ;;  %vm3414_vm5 = vmmov 0   ;;  %v456_v25 = vld [vmem:[#allocation15] sm:$0x3f] }
 0x165   :  { %2463 = vmatpush3.msk.msra.mxu1 %vm592_vm3, %v454_v10  ;;  %v2310_v30 = vld [vmem:[#allocation13] ss:$0 sm:$0xff]  ;;  %v3708_v49 = vld [vmem:[#allocation6] sm:$0xff]   ;;  %vm759_vm6 = vcmask 261120   ;;  %s460_s25 = sld [smem:[#allocation2]]  ;;  %s3724_s28 = smov 0  }
 0x166   :  { %2476 = vmatprep.subr.bf16.mxu1 %v3413_v24  ;;  %v458_v59 = vld [vmem:[#allocation18] sm:$0x3f]  ;;  %v2322_v60 = vld [vmem:[#allocation16] ss:$0 sm:$0xff] }
 0x168   :  { %v3657_v1 = vld [vmem:[%s3944_s6] sm:$0xff]  ;;  %v3660_v2 = vld [vmem:[%s3944_s6 + $0x8] sm:$0xff]  ;;  %v3666_v3 = vld [vmem:[%s3944_s6 + $0x10] sm:$0xff] }
 0x169   :  { %2456 = vmatprep.mubr.msk.f32.mxu0 %vm467_vm1, %v3657_v1  ;;  %v3674_v4 = vld [vmem:[%s3944_s6 + $0x18] sm:$0xff]  ;;  %v3679_v5 = vld [vmem:[%s3945_s23] sm:$0xff]  ;;  %v3682_v6 = vld [vmem:[%s3945_s23 + $0x8] sm:$0xff] }
 0x16a   :  { %2457 = vmatmul.mubr.msk.f32.vlgmr.msra.gmra.mxu0 %vm467_vm1, %v3660_v2  ;;  %v681_v7 = vpack.c.bf16 %v3682_v6, %v3679_v5  ;;  %v3687_v8 = vld [vmem:[%s3946_s26] sm:$0xff]   ;;  %v3690_v9 = vld [vmem:[%s3946_s26 + $0x8] sm:$0xff]  }
 0x16b   :  { %2459 = vmatprep.mubr.msk.f32.mxu0 %vm467_vm1, %v3666_v3  ;;  %s804_s20 = sadd.f32 1.0, %s460_s25 }
 0x16c   :  { %2470 = vmatprep.subr.bf16.mxu0 %v681_v7 }
 0x16d   :  { %2471 = vmatpush3.bf16.msra.mxu0 %v681_v7  ;;  %v805_v50 = vstv %s804_s20  ;;  %v2326_v7 = vld [vmem:[#allocation19] ss:$0 sm:$0xff] }
 0x16e   :  { %2460 = vmatmul.mubr.msk.f32.gmra.mxu0 %vm467_vm1, %v3674_v4  ;;  %2484 = vmatprep.subr.msk.mxu0 %vm592_vm3, %v456_v25  ;;  %v806_v51 = vmul.f32 %v805_v50, %v3679_v5  ;;  %v807_v54 = vmul.f32 %v805_v50, %v3682_v6 }
 0x16f   :  { %2472 = vmatprep.mubr.msk.bf16.mxu0 %vm692_vm2, %v3687_v8 }
 0x172   :  { %2473 = vmatmul.mubr.msk.bf16.vlgmr.msra.gmra.mxu0 %vm692_vm2, %v3690_v9 }
 0x173   :  { %2485 = vmatpush3.msk.msra.mxu0 %vm592_vm3, %v456_v25 }
 0x22a   :  { %v2458_v12 = vpop.f32.mrf.mxu0 }
 0x22b   :  { %v556_v13 = vadd.f32 %v2458_v12, %v2304_v11 }
 0x22c   :  { %v550_v14 = vpop.f32.mrf.mxu0 }
 0x22d   :  { %v551_v15 = vadd.f32 %v2304_v11, %v550_v14  ;;  %v570_v18 = vmax.f32 %v556_v13, 0.0 }
 0x22e   :  { %v2461_v16 = vpop.f32.mrf.mxu0 }
 0x22f   :  { %v569_v17 = vmax.f32 %v551_v15, 0.0  ;;  %v566_v19 = vadd.f32 %v2461_v16, %v2304_v11 }
 0x230   :  { %v560_v20 = vpop.f32.mrf.mxu0 }
 0x231   :  { %v561_v21 = vadd.f32 %v2304_v11, %v560_v20  ;;  %2464 = vmatprep.mubr.msk.f32.mxu1 %vm579_vm4, %v569_v17  ;;  %v572_v23 = vmax.f32 %v566_v19, 0.0 }
 0x232   :  { %2465 = vmatmul.mubr.msk.f32.vlgmr.msra.gmra.mxu1 %vm579_vm4, %v570_v18  ;;  %v2474_v26 = vpop.f32.mrf.mxu0 }
 0x233   :  { %v571_v22 = vmax.f32 %v561_v21, 0.0 }
 0x234   :  { %v733_v27 = vpop.f32.mrf.mxu0 }
 0x235   :  { %2467 = vmatprep.mubr.msk.f32.mxu1 %vm579_vm4, %v571_v22 }
 0x236   :  { %2468 = vmatmul.mubr.msk.f32.gmra.mxu1 %vm579_vm4, %v572_v23  ;;  %v2475_v31 = vpop.f32.mrf.mxu0 }
 0x237   :  { %2480 = vmatprep.mubr.msk.bf16.mxu1 %vm3414_vm5, %v3413_v24 }
 0x238   :  { %v736_v39 = vpop.f32.mrf.mxu0 }
 0x2f2   :  { %v2466_v28 = vpop.f32.mrf.mxu1 }
 0x2f3   :  { %v668_v36 = vadd.f32 %v2466_v28, %v2310_v30 }
 0x2f4   :  { %v662_v29 = vpop.f32.mrf.mxu1 }
 0x2f5   :  { %v663_v33 = vadd.f32 %v2310_v30, %v662_v29  ;;  %v737_v42 = vadd.f32 %v736_v39, %v668_v36 }
 0x2f6   :  { %v2469_v32 = vpop.f32.mrf.mxu1 }
 0x2f7   :  { %v678_v34 = vadd.f32 %v2469_v32, %v2310_v30  ;;  %v734_v40 = vadd.f32 %v733_v27, %v663_v33  ;;  %v749_v47 = vmax.f32 %v737_v42, 0.0 }
 0x2f8   :  { %v672_v35 = vpop.f32.mrf.mxu1 }
 0x2f9   :  { %v745_v37 = vadd.f32 %v2475_v31, %v678_v34  ;;  %v673_v38 = vadd.f32 %v2310_v30, %v672_v35  ;;  %v748_v45 = vmax.f32 %v734_v40, 0.0 }
 0x2fb   :  { %v742_v41 = vadd.f32 %v2474_v26, %v673_v38  ;;  %v751_v43 = vmax.f32 %v745_v37, 0.0  ;;  %v752_v48 = vpack.c.bf16 %v749_v47, %v748_v45 }
 0x2fd   :  { %v750_v44 = vmax.f32 %v742_v41, 0.0 }
 0x2ff   :  { %v753_v46 = vpack.c.bf16 %v751_v43, %v750_v44 }
 0x301   :  { %2477 = vmatpush3.bf16.msra.mxu1 %v753_v46 }
 0x302   :  { %2478 = vmatprep.subr.bf16.mxu1 %v3413_v24 }
 0x305   :  { %2479 = vmatpush3.bf16.msra.mxu1 %v752_v48 }
 0x306   :  { %2489 = vmatprep.subr.msk.mxu1 %vm592_vm3, %v458_v59 }
 0x308   :  { %2481 = vmatmul.mubr.msk.bf16.vlgmr.msra.gmra.mxu1 %vm759_vm6, %v3708_v49 }
 0x309   :  { %2490 = vmatpush3.msk.msra.mxu1 %vm592_vm3, %v458_v59 }
 0x3c8   :  { %v797_v52 = vpop.f32.mrf.mxu1 }
 0x3c9   :  { %v808_v53 = vadd.f32 %v806_v51, %v797_v52 }
 0x3ca   :  { %v2482_v55 = vpop.f32.mrf.mxu1 }
 0x3cb   :  { %2486 = vmatprep.mubr.msk.f32.mxu0 %vm579_vm4, %v808_v53 }
 0x3cc   :  { %v800_v56 = vpop.f32.mrf.mxu1 }
 0x3cd   :  { %v809_v57 = vadd.f32 %v807_v54, %v800_v56 }
 0x3ce   :  { %v2483_v58 = vpop.f32.mrf.mxu1 }
 0x3cf   :  { %2487 = vmatmul.mubr.msk.f32.vlgmr.msra.gmra.mxu0 %vm579_vm4, %v809_v57 }
 0x48f   :  { %v2488_v61 = vpop.f32.mrf.mxu0 }
 0x490   :  { %v897_v62 = vadd.f32 %v2488_v61, %v2322_v60 }
 0x491   :  { %v891_v63 = vpop.f32.mrf.mxu0 }
 0x492   :  { %v892_v0 = vadd.f32 %v2322_v60, %v891_v63  ;;  %v901_v6 = vmax.f32 %v897_v62, 0.0 }
 0x494   :  { %v900_v5 = vmax.f32 %v892_v0, 0.0 }
 0x496   :  { %2491 = vmatprep.mubr.msk.f32.mxu1 %vm579_vm4, %v900_v5 }
 0x497   :  { %2492 = vmatmul.mubr.msk.f32.vlgmr.msra.gmra.mxu1 %vm579_vm4, %v901_v6 }
 0x557   :  { %v2493_v10 = vpop.f32.mrf.mxu1 }
 0x558   :  { %v989_v11 = vadd.f32 %v2493_v10, %v2326_v7 }
 0x559   :  { %v983_v12 = vpop.f32.mrf.mxu1 }
 0x55a   :  { %v993_v13 = vmax.f32 %v989_v11, 0.0   ;;  %v984_v14 = vadd.f32 %v2326_v7, %v983_v12 }
 0x55c   :  { %v992_v15 = vmax.f32 %v984_v14, 0.0  }
 0x55d LB: > { %s3947_s3 = sld [smem:[#allocation62_spill]]  ;;  %2496 = vmatprep.mubr.msk.f32.mxu0 %vm467_vm1, %v3657_v1  ;;  %s2330_s21 = sshll.u32 %s3333_s28, 2  ;;  %v1232_v17 = vpack.c.bf16 %v3325_v13, %v3329_v15  ;;  %v3415_v36 = vmov 0.0   ;;  %vm3416_vm7 = vmmov 0   ;;  %s3333_s28 = sphi %s3724_s28, %s3952_s28   ;;  %v3329_v15 = vphi %v992_v15, %v3951_v15   ;;  %v3325_v13 = vphi %v993_v13, %v3950_v13  }
 0x55e   : > { %s1003_s9 = scalar_lea.vmem [#allocation21], %s2330_s21  ;;  %s3749_s18 = sshll.u32 %s3333_s28, 5 }
 0x55f   : > { %v1004_v16 = vld [vmem:[%s1003_s9] sm:$0xf]  ;;  %s1005_s17 = scalar_lea.vmem [#allocation22], %s3333_s28  ;;  %s3763_s2 = scalar_lea.vmem [#allocation25], %s3749_s18 }
 0x560   : > { %2494 = vmatprep.subr.msk.mxu0 %vm480_vm0, %v1004_v16  ;;  %v2332_v22 = vld [vmem:[%s1005_s17] ss:$0 sm:$0xff]  ;;  %v1019_v37 = vld [vmem:[%s3763_s2 + $0x18] sm:$0xff]  ;;  %s1013_s7 = scalar_lea.vmem [#allocation24], %s3333_s28  ;;  %v1018_v62 = vld [vmem:[%s3763_s2 + $0x10] sm:$0xff]  ;;  %s3773_s0 = sadd.s32 1, %s3333_s28  }
 0x561   : > { %2495 = vmatpush3.msk.msra.mxu0 %vm480_vm0, %v1004_v16  ;;  %v2338_v42 = vld [vmem:[%s1013_s7] ss:$0 sm:$0xff]  ;;  %v1017_v63 = vld [vmem:[%s3763_s2 + $0x8] sm:$0xff]  ;;  %s1030_s29 = sld [smem:[#allocation2 + %s3773_s0]]  ;;  %s1022_s27 = scalar_lea.vmem [#allocation28], %s3749_s18 }
 0x562   : > { %2497 = vmatmul.mubr.msk.f32.vlgmr.msra.gmra.mxu0 %vm467_vm1, %v3660_v2  ;;  %2516 = vmatprep.subr.bf16.mxu0 %v1232_v17  ;;  %v1016_v0 = vld [vmem:[%s3763_s2] sm:$0xff]  ;;  %s1020_s4 = scalar_lea.vmem [#allocation27], %s3333_s28  ;;  %s1027_s14 = scalar_lea.vmem [#allocation30], %s3333_s28 }
 0x563   : > { %2499 = vmatprep.mubr.msk.f32.mxu0 %vm467_vm1, %v3666_v3  ;;  %s1008_s1 = scalar_lea.vmem %s3947_s3, %s3749_s18  ;;  %2517 = vmatpush3.bf16.msra.mxu0 %v1232_v17  ;;  %p996_p8 = scmp.ge.s32.totalorder %s3773_s0, 5  }
 0x564   : > { %v1012_v18 = vld [vmem:[%s1008_s1 + $0x18] sm:$0xff]  ;;  %v1011_v19 = vld [vmem:[%s1008_s1 + $0x10] sm:$0xff]  ;;  %v1010_v20 = vld [vmem:[%s1008_s1 + $0x8] sm:$0xff]  ;;  %2530 = vmatprep.subr.mxu0 %v1019_v37  ;;  %s3952_s28 = smov %s3773_s0  ;;  %s3953_s5 = sld [smem:[#allocation68_spill]] (%p996_p8) }
 0x565   : > { %2502 = vmatprep.subr.mxu1 %v1012_v18  ;;  %v1009_v21 = vld [vmem:[%s1008_s1] sm:$0xff]  ;;  %v3821_v2 = vld [vmem:[#allocation34 + $0x10] sm:$0xff] (%p996_p8)  ;;  %v3823_v3 = vld [vmem:[#allocation34 + $0x18] sm:$0xff] (%p996_p8)  ;;  %s3834_s24 = smov (%p996_p8), 0  }
 0x566   : > { %2500 = vmatmul.mubr.msk.f32.gmra.mxu0 %vm467_vm1, %v3674_v4  ;;  %2503 = vmatpush3.msra.mxu1 %v1012_v18  ;;  %v1026_v18 = vld [vmem:[%s1022_s27 + $0x18] sm:$0xff]  ;;  %v3819_v1 = vld [vmem:[#allocation34 + $0x8] sm:$0xff] (%p996_p8) }
 0x567   : > { %2518 = vmatprep.mubr.msk.bf16.mxu0 %vm692_vm2, %v3687_v8  ;;  %2504 = vmatprep.subr.mxu1 %v1011_v19  ;;  %s1329_s10 = sadd.f32 1.0, %s1030_s29  ;;  %v1526_v4 = vld [vmem:[#allocation36] sm:$0x1] (%p996_p8) }
 0x568   : > { %2505 = vmatpush3.msra.mxu1 %v1011_v19  ;;  %v1025_v19 = vld [vmem:[%s1022_s27 + $0x10] sm:$0xff] }
 0x569   : > { %2506 = vmatprep.subr.mxu1 %v1010_v20  ;;  %v1330_v5 = vstv %s1329_s10 }
 0x56a   : > { %2519 = vmatmul.mubr.msk.bf16.vlgmr.msra.gmra.mxu0 %vm692_vm2, %v3690_v9  ;;  %2507 = vmatpush3.msra.mxu1 %v1010_v20  ;;  %v1331_v6 = vmul.f32 %v3329_v15, %v1330_v5  ;;  %v1332_v11 = vmul.f32 %v3325_v13, %v1330_v5  ;;  %v1024_v15 = vld [vmem:[%s1022_s27 + $0x8] sm:$0xff]  ;;  %v1023_v13 = vld [vmem:[%s1022_s27] sm:$0xff] }
 0x56b   : > { %2508 = vmatprep.subr.mxu1 %v1009_v21  ;;  %2531 = vmatpush3.msra.mxu0 %v1019_v37  ;;  %v2346_v20 = vld [vmem:[%s1020_s4] ss:$0 sm:$0xff]  ;;  %v3803_v37 = vld [vmem:[#allocation31 + $0x8] sm:$0xff] (%p996_p8) }
 0x56c   : > { %2509 = vmatpush3.msra.mxu1 %v1009_v21  ;;  %2532 = vmatprep.subr.mxu0 %v1018_v62  ;;  %v1527_v8 = vld [vmem:[%s3953_s5] sm:$0x1] (%p996_p8) }
 0x56d   : > { %2522 = vmatprep.subr.bf16.mxu1 %v3415_v36  ;;  %2533 = vmatpush3.msra.mxu0 %v1018_v62  ;;  %v3826_v9 = vadd.f32 (%p996_p8), %v1527_v8, %v1526_v4 }
 0x56e   : > { %2534 = vmatprep.subr.mxu0 %v1017_v63 }
 0x56f   : > { %2535 = vmatpush3.msra.mxu0 %v1017_v63 }
 0x570   : > { %2536 = vmatprep.subr.mxu0 %v1016_v0 }
 0x571   : > { %2537 = vmatpush3.msra.mxu0 %v1016_v0 }
 0x622   : > { %v2498_v23 = vpop.f32.mrf.mxu0 }
 0x623   : > { %v1112_v25 = vadd.f32 %v2498_v23, %v2332_v22 }
 0x624   : > { %v1106_v26 = vpop.f32.mrf.mxu0 }
 0x625   : > { %v1107_v27 = vadd.f32 %v2332_v22, %v1106_v26  ;;  %v1126_v30 = vmax.f32 %v1112_v25, 0.0 }
 0x626   : > { %v2501_v28 = vpop.f32.mrf.mxu0 }
 0x627   : > { %v1125_v29 = vmax.f32 %v1107_v27, 0.0  ;;  %v1122_v31 = vadd.f32 %v2501_v28, %v2332_v22  ;;  %v2349_v28 = vld [vmem:[%s1027_s14] ss:$0 sm:$0xff] }
 0x628   : > { %v1116_v32 = vpop.f32.mrf.mxu0 }
 0x629   : > { %v1117_v33 = vadd.f32 %v2332_v22, %v1116_v32  ;;  %2510 = vmatprep.mubr.msk.f32.mxu1 %vm759_vm6, %v1125_v29  ;;  %v1128_v35 = vmax.f32 %v1122_v31, 0.0 }
 0x62a   : > { %2511 = vmatmul.mubr.msk.f32.vlgmr.msra.gmra.mxu1 %vm759_vm6, %v1126_v30  ;;  %v2520_v38 = vpop.f32.mrf.mxu0 }
 0x62b   : > { %v1127_v34 = vmax.f32 %v1117_v33, 0.0 }
 0x62c   : > { %v1267_v39 = vpop.f32.mrf.mxu0 }
 0x62d   : > { %2513 = vmatprep.mubr.msk.f32.mxu1 %vm759_vm6, %v1127_v34 }
 0x62e   : > { %2514 = vmatmul.mubr.msk.f32.gmra.mxu1 %vm759_vm6, %v1128_v35  ;;  %v2521_v43 = vpop.f32.mrf.mxu0  ;;  %v3799_v35 = vld [vmem:[#allocation7] sm:$0x3] (%p996_p8) }
 0x62f   : > { %2526 = vmatprep.mubr.msk.bf16.mxu1 %vm3416_vm7, %v3415_v36 }
 0x630   : > { %v1270_v52 = vpop.f32.mrf.mxu0 }
 0x6ea   : > { %v2512_v40 = vpop.f32.mrf.mxu1 }
 0x6eb   : > { %v1219_v48 = vadd.f32 %v2512_v40, %v2338_v42  ;;  %v3809_v40 = vld [vmem:[#allocation33] sm:$0xff] (%p996_p8) }
 0x6ec   : > { %v1213_v41 = vpop.f32.mrf.mxu1 }
 0x6ed   : > { %v1214_v45 = vadd.f32 %v2338_v42, %v1213_v41  ;;  %v1271_v55 = vadd.f32 %v1270_v52, %v1219_v48  ;;  %v3811_v41 = vld [vmem:[#allocation33 + $0x8] sm:$0xff] (%p996_p8) }
 0x6ee   : > { %v2515_v44 = vpop.f32.mrf.mxu1 }
 0x6ef   : > { %v1229_v46 = vadd.f32 %v2515_v44, %v2338_v42  ;;  %v1268_v53 = vadd.f32 %v1267_v39, %v1214_v45  ;;  %v1283_v60 = vmax.f32 %v1271_v55, 0.0  ;;  %v3807_v39 = vld [vmem:[#allocation31 + $0x18] sm:$0xff] (%p996_p8)  ;;  %v3817_v44 = vld [vmem:[#allocation34] sm:$0xff] (%p996_p8)  ;;  %v3830_v45 = vmov (%p996_p8), 0.0  }
 0x6f0   : > { %v1223_v47 = vpop.f32.mrf.mxu1 }
 0x6f1   : > { %v1279_v50 = vadd.f32 %v2521_v43, %v1229_v46  ;;  %v1224_v51 = vadd.f32 %v2338_v42, %v1223_v47  ;;  %v1282_v58 = vmax.f32 %v1268_v53, 0.0  ;;  %v3813_v42 = vld [vmem:[#allocation33 + $0x10] sm:$0xff] (%p996_p8)  ;;  %v3815_v43 = vld [vmem:[#allocation33 + $0x18] sm:$0xff] (%p996_p8)  ;;  %v3832_v46 = vmov (%p996_p8), 0.0  }
 0x6f3   : > { %v1276_v54 = vadd.f32 %v2520_v38, %v1224_v51  ;;  %v1285_v56 = vmax.f32 %v1279_v50, 0.0  ;;  %v1286_v61 = vpack.c.bf16 %v1283_v60, %v1282_v58  ;;  %v3805_v38 = vld [vmem:[#allocation31 + $0x10] sm:$0xff] (%p996_p8) }
 0x6f5   : > { %v1284_v57 = vmax.f32 %v1276_v54, 0.0 }
 0x6f7   : > { %v1287_v59 = vpack.c.bf16 %v1285_v56, %v1284_v57 }
 0x6f9   : > { %2523 = vmatpush3.bf16.msra.mxu1 %v1287_v59 }
 0x6fa   : > { %2524 = vmatprep.subr.bf16.mxu1 %v3415_v36  ;;  %v3801_v36 = vld [vmem:[#allocation31] sm:$0xff] (%p996_p8) }
 0x6fd   : > { %2525 = vmatpush3.bf16.msra.mxu1 %v1286_v61 }
 0x6fe   : > { %2541 = vmatprep.subr.mxu1 %v1026_v18 }
 0x700   : > { %2527 = vmatmul.mubr.msk.bf16.vlgmr.msra.gmra.mxu1 %vm759_vm6, %v3708_v49  ;;  %v3828_v49 = vmov (%p996_p8), 0.0  }
 0x701   : > { %2542 = vmatpush3.msra.mxu1 %v1026_v18 }
 0x702   : > { %2543 = vmatprep.subr.mxu1 %v1025_v19 }
 0x703   : > { %2544 = vmatpush3.msra.mxu1 %v1025_v19 }
 0x704   : > { %2545 = vmatprep.subr.mxu1 %v1024_v15 }
 0x705   : > { %2546 = vmatpush3.msra.mxu1 %v1024_v15 }
 0x706   : > { %2547 = vmatprep.subr.mxu1 %v1023_v13 }
 0x707   : > { %2548 = vmatpush3.msra.mxu1 %v1023_v13 }
 0x7c0   : > { %v1322_v7 = vpop.f32.mrf.mxu1 }
 0x7c1   : > { %v1333_v10 = vadd.f32 %v1331_v6, %v1322_v7 }
 0x7c2   : > { %v2528_v12 = vpop.f32.mrf.mxu1 }
 0x7c3   : > { %2538 = vmatprep.mubr.msk.f32.mxu0 %vm759_vm6, %v1333_v10 }
 0x7c4   : > { %v1325_v14 = vpop.f32.mrf.mxu1 }
 0x7c5   : > { %v1334_v16 = vadd.f32 %v1332_v11, %v1325_v14 }
 0x7c6   : > { %v2529_v17 = vpop.f32.mrf.mxu1 }
 0x7c7   : > { %2539 = vmatmul.mubr.msk.f32.vlgmr.msra.gmra.mxu0 %vm759_vm6, %v1334_v16 }
 0x887   : > { %v2540_v21 = vpop.f32.mrf.mxu0 }
 0x888   : > { %v1419_v22 = vadd.f32 %v2540_v21, %v2346_v20 }
 0x889   : > { %v1413_v23 = vpop.f32.mrf.mxu0 }
 0x88a   : > { %v1414_v25 = vadd.f32 %v2346_v20, %v1413_v23  ;;  %v1423_v27 = vmax.f32 %v1419_v22, 0.0 }
 0x88c   : > { %v1422_v26 = vmax.f32 %v1414_v25, 0.0 }
 0x88e   : > { %2549 = vmatprep.mubr.msk.f32.mxu1 %vm759_vm6, %v1422_v26 }
 0x88f   : > { %2550 = vmatmul.mubr.msk.f32.vlgmr.msra.gmra.mxu1 %vm759_vm6, %v1423_v27 }
 0x94f   : > { %v2551_v29 = vpop.f32.mrf.mxu1 }
 0x950   : > { %v1508_v30 = vadd.f32 %v2551_v29, %v2349_v28 }
 0x951   : > { %v1502_v31 = vpop.f32.mrf.mxu1 }
 0x952   : > { %v3785_v13 = vmax.f32 %v1508_v30, 0.0   ;;  %v1503_v33 = vadd.f32 %v2349_v28, %v1502_v31 }
 0x953   :  { %998 = sbr.rel (!%p996_p8) target bundleno = 1373 (0x55d), region = 298 }
 0x954   : > { %v3948_v32 = vmov %v3785_v13  ;;  %v3787_v15 = vmax.f32 %v1503_v33, 0.0  }
 0x955   : > { %v3950_v13 = vmov %v3948_v32 }
 0x956   : > { %v3949_v34 = vmov %v3787_v15 }
 0x957   : > { %v3951_v15 = vmov %v3949_v34 }
 0x958 LB: > { %v3417_v47 = vmov 0.0   ;;  %vm3418_vm8 = vmmov 0   ;;  %s3419_s15 = smov 32   ;;  %v1758_v52 = vlaneseq  ;;  %s3420_s12 = smov 64   ;;  %vm1869_vm9 = vcmp.gt.f32.partialorder %v3799_v35, 0.0  ;;  %s3349_s24 = sphi %s3834_s24, %s1534_s24   ;;  %v3345_v46 = vphi %v3832_v46, %v3955_v46   ;;  %v3341_v45 = vphi %v3830_v45, %v1781_v45   ;;  %v3337_v49 = vphi %v3828_v49, %v3954_v49  }
 0x959   : > { %2552 = vmatprep.subr.mxu0 %v3417_v47  ;;  %2560 = vmatprep.mubr.msk.f32.mxu0 %vm3418_vm8, %v3417_v47  ;;  %vm1871_vm10 = vcmask 123904   ;;  %s1534_s24 = sadd.s32 1, %s3349_s24  }
 0x95a   : > { %1612 = vrot.lane.b32.xlu0 %v3345_v46, %s3419_s15  ;;  %2553 = vmatpush3.msra.mxu0 %v3815_v43  ;;  %v1759_v53 = vshrl.u32 %v1758_v52, 7  ;;  %p1531_p9 = scmp.ge.s32.totalorder %s1534_s24, 6  }
 0x95b   : > { %2554 = vmatprep.subr.mxu0 %v3417_v47  ;;  %2563 = vmatprep.subr.mxu1 %v3417_v47  ;;  %v1964_v8 = vld [vmem:[#allocation39 + $0x18] sm:$0xff] (%p1531_p9)  ;;  %s3421_s11 = smov (%p1531_p9), 32   ;;  %v1957_v35 = vld [vmem:[#allocation37] sm:$0xff] (%p1531_p9)  ;;  %s3422_s16 = smov (%p1531_p9), [#allocation40]   ;;  %vm2206_vm11 = vcmask (%p1531_p9), 91136  }
 0x95c   : > { %2555 = vmatpush3.msra.mxu0 %v3813_v42  ;;  %2564 = vmatpush3.msra.mxu1 %v3807_v39  ;;  %v1760_v54 = vsub.s32 0, %v1759_v53  ;;  %v2123_v39 = vld [vmem:[%s3581_s30 + $0x8] sm:$0xff] (%p1531_p9)  ;;  %s2214_s22 = sshll.u32 (%p1531_p9), %s3422_s16, 4  ;;  %s2215_s22 = int_to_ptr.vmem [resolvable:$true] %s2214_s22 }
 0x95d   : > { %2556 = vmatprep.subr.mxu0 %v3417_v47  ;;  %2565 = vmatprep.subr.mxu1 %v3417_v47  ;;  %p3252_p11 = scmp.lt.s32.totalorder (%p1531_p9), %s2215_s22, %s2215_s22 }
 0x95e   : > { %2557 = vmatpush3.msra.mxu0 %v3811_v41  ;;  %2566 = vmatpush3.msra.mxu1 %v3805_v38  ;;  %v1761_v58 = vrot.slane %v3826_v9, %v1760_v54  ;;  %v2124_v38 = vld [vmem:[%s3581_s30 + $0x10] sm:$0xff] (%p1531_p9) }
 0x95f   : > { %2558 = vmatprep.subr.mxu0 %v3417_v47  ;;  %2567 = vmatprep.subr.mxu1 %v3417_v47 }
 0x960   : > { %2559 = vmatpush3.msra.mxu0 %v3809_v40  ;;  %2568 = vmatpush3.msra.mxu1 %v3803_v37  ;;  %v2125_v37 = vld [vmem:[%s3581_s30 + $0x18] sm:$0xff] (%p1531_p9)  ;;  %v2122_v40 = vld [vmem:[%s3581_s30] sm:$0xff] (%p1531_p9)  ;;  %s3247_s30 = scalar_lea.vmem (%p1531_p9), %s2215_s22, 32 }
 0x961   : > { %2574 = vmatprep.subr.mxu0 %v3417_v47  ;;  %2561 = vmatmul.mubr.msk.f32.vlgmr.msra.gmra.mxu0 %vm759_vm6, %v3337_v49  ;;  %p3248_p10 = scmp.ne.s32.totalorder (%p1531_p9), %s2215_s22, %s3247_s30  ;;  %p3253_p12 = scmp.lt.s32.totalorder (%p1531_p9), %s3247_s30, %s3247_s30 }
 0x962   : > { %2575 = vmatpush3.msra.mxu0 %v3823_v3  ;;  %2569 = vmatprep.subr.mxu1 %v3417_v47 }
 0x963   : > { %2576 = vmatprep.subr.mxu0 %v3417_v47  ;;  %2570 = vmatpush3.msra.mxu1 %v3801_v36  ;;  %p3254_p13 = por (%p1531_p9), %p3253_p12, %p3252_p11 }
 0x964   : > { %2577 = vmatpush3.msra.mxu0 %v3821_v2  ;;  %2571 = vmatprep.mubr.msk.f32.mxu1 %vm3418_vm8, %v3417_v47 }
 0x965   : > { %2578 = vmatprep.subr.mxu0 %v3417_v47  ;;  %2582 = vmatprep.mubr.msk.f32.mxu0 %vm3418_vm8, %v3417_v47  ;;  %p3255_p0 = pnand (%p1531_p9), %p3254_p13, %p3248_p10 }
 0x966   : > { %2579 = vmatpush3.msra.mxu0 %v3819_v1  ;;  %2585 = vmatprep.subr.mxu1 %v3417_v47 }
 0x967   : > { %2580 = vmatprep.subr.mxu0 %v3417_v47 }
 0x968   : > { %2581 = vmatpush3.msra.mxu0 %v3817_v44  ;;  %v2362_v44 = vld [vmem:[%s3576_s13] ss:$0 sm:$0xff] (%p1531_p9) }
 0x969   : > { %2592 = vmatprep.subr.mxu0 %v3417_v47 }
 0x9cc   : > { %v1613_v48 = vpop.permute.xlu0 %1612 }
 0x9cd   : > { %2572 = vmatmul.mubr.msk.f32.vlgmr.msra.gmra.mxu1 %vm759_vm6, %v1613_v48  ;;  %2583 = vmatmul.mubr.msk.f32.vlgmr.msra.gmra.mxu0 %vm759_vm6, %v1613_v48  ;;  %v1959_v48 = vld [vmem:[#allocation37 + $0x10] sm:$0xff] (%p1531_p9) }
 0x9ce   : > { %2586 = vmatpush3.xpose.msk.msra.mxu1 %vm759_vm6, %v3948_v32  ;;  %2589 = vmatprep.mubr.msk.f32.mxu1 %vm3418_vm8, %v3417_v47 }
 0x9cf   : > { %2587 = vmatprep.subr.mxu1 %v3417_v47  ;;  %2593 = vmatpush3.msra.mxu0 %v3948_v32  ;;  %v1961_v32 = vld [vmem:[#allocation39] sm:$0xff] (%p1531_p9) }
 0x9d0   : > { %2594 = vmatprep.subr.mxu0 %v3417_v47  ;;  %2596 = vmatprep.mubr.msk.f32.mxu0 %vm3418_vm8, %v3417_v47  ;;  %v1960_v47 = vld [vmem:[#allocation37 + $0x18] sm:$0xff] (%p1531_p9) }
 0x9d1   : > { %2595 = vmatpush3.msra.mxu0 %v3949_v34 }
 0x9d2   : > { %2588 = vmatpush3.xpose.msk.msra.mxu1 %vm759_vm6, %v3949_v34  ;;  %2599 = vmatprep.subr.mxu0 (%p1531_p9), %v3413_v24  ;;  %v1958_v34 = vld [vmem:[#allocation37 + $0x8] sm:$0xff] (%p1531_p9) }
 0x9d3   :  { %2610 = vmatprep.subr.mxu1 (%p1531_p9), %v3413_v24 }
 0xa21   : > { %v1607_v50 = vpop.f32.mrf.mxu0 }
 0xa23   : > { %v2562_v51 = vpop.f32.mrf.mxu0 }
 0xa8d   : > { %v1682_v55 = vpop.f32.mrf.mxu1  ;;  %v1752_v56 = vpop.f32.mrf.mxu0 }
 0xa8e   : > { %v1683_v57 = vadd.f32 %v1682_v55, %v1607_v50  ;;  %v1962_v50 = vld [vmem:[#allocation39 + $0x8] sm:$0xff] (%p1531_p9) }
 0xa8f   : > { %v2573_v59 = vpop.f32.mrf.mxu1  ;;  %v2584_v60 = vpop.f32.mrf.mxu0 }
 0xa90   : > { %v1756_v61 = vadd.f32 %v1752_v56, %v1683_v57 }
 0xa92   : > { %v1763_v62 = vadd.f32 %v1761_v58, %v1756_v61 }
 0xa94   : > { %2763 = vtanh.f32 %v1763_v62  ;;  %v2355_v0 = vmul.f32 -1.442695, %v1763_v62 }
 0xa96   : > { %2765 = vpow2.f32 %v2355_v0 }
 0xaa1   : > { %v2764_v63 = vpop.eup %2763 }
 0xaa2   : > { %1773 = vrot.lane.b32.xlu0 %v2764_v63, %s3420_s12 }
 0xaa3   : > { %v2766_v5 = vpop.eup %2765 }
 0xaa4   : > { %v1767_v6 = vadd.f32 1.0, %v2766_v5 }
 0xaa6   : > { %2767 = vrcp.f32 %v1767_v6 }
 0xab3   : > { %v2768_v7 = vpop.eup %2767 }
 0xab4   : > { %v1771_v12 = vmul.f32 %v3341_v45, %v2768_v7 }
 0xb14   : > { %v1774_v10 = vpop.permute.xlu0 %1773 }
 0xb15   : > { %v1776_v11 = vmul.f32 %v2768_v7, %v1774_v10 }
 0xb17   : > { %1778 = vrot.lane.b32.xlu1 %v1776_v11, %s3419_s15 }
 0xb89   : > { %v1779_v14 = vpop.permute.xlu1 %1778 }
 0xb8a   : > { %v1781_v45 = vadd.f32 %v1779_v14, %v1771_v12  }
 0xb8c   : > { %2769 = vtanh.f32 %v1781_v45 }
 0xb99   : > { %v2770_v16 = vpop.eup %2769 }
 0xb9a   : > { %1784 = vrot.lane.b32.xlu1 %v2770_v16, %s3420_s12 }
 0xc0c   : > { %v1785_v17 = vpop.permute.xlu1 %1784 }
 0xc0d   : > { %v1787_v18 = vmul.f32 %v2768_v7, %v1785_v17  }
 0xc0f   : > { %1789 = vrot.lane.b32.xlu0 %v1787_v18, %s3419_s15  ;;  %v3955_v46 = vmov %v1787_v18 }
 0xc10   :  { %v1963_v46 = vld [vmem:[#allocation39 + $0x10] sm:$0xff] (%p1531_p9) }
 0xc81   : > { %v1790_v19 = vpop.permute.xlu0 %1789 }
 0xc82   : > { %2590 = vmatmul.mubr.msk.f32.vlgmr.msra.gmra.mxu1 %vm759_vm6, %v1790_v19 }
 0xc83   :  { %2611 = vmatpush3.msra.mxu1 (%p1531_p9), %v1960_v47  ;;  %2618 = vmatprep.mubr.msk.f32.mxu1 (%p1531_p9), %vm3414_vm5, %v3413_v24 }
 0xc84   :  { %2612 = vmatprep.subr.mxu1 (%p1531_p9), %v3413_v24 }
 0xc85   :  { %2613 = vmatpush3.msra.mxu1 (%p1531_p9), %v1959_v48 }
 0xc86   :  { %2614 = vmatprep.subr.mxu1 (%p1531_p9), %v3413_v24 }
 0xc87   :  { %2615 = vmatpush3.msra.mxu1 (%p1531_p9), %v1958_v34 }
 0xc88   :  { %2616 = vmatprep.subr.mxu1 (%p1531_p9), %v3413_v24 }
 0xc89   :  { %2617 = vmatpush3.msra.mxu1 (%p1531_p9), %v1957_v35 }
 0xd42   : > { %v1865_v15 = vpop.f32.mrf.mxu1 }
 0xd43   : > { %v1870_v13 = vsel %vm1869_vm9, %v1865_v15, -1e+30 }
 0xd44   : > { %v2591_v20 = vpop.f32.mrf.mxu1  ;;  %v1872_v21 = vsel %vm1871_vm10, %v1870_v13, -inf }
 0xd45   : > { %1873 = vmax.xlane.f32.xlu1 %v1872_v21 }
 0xdce   : > { %v1874_v22 = vpop.xlane.xlu1 %1873 }
 0xdcf   : > { %v1875_v23 = vsub.f32 %v1870_v13, %v1874_v22 }
 0xdd1   : > { %v1876_v25 = vmul.f32 1.442695, %v1875_v23 }
 0xdd3   : > { %2771 = vpow2.f32 %v1876_v25 }
 0xde0   : > { %v2772_v26 = vpop.eup %2771 }
 0xde1   : > { %v1878_v27 = vsel %vm1871_vm10, %v2772_v26, 0.0 }
 0xde2   : > { %1879 = vadd.xlane.f32.xlu0 %v1878_v27 }
 0xdf8   :  { %2039 = vrot.lane.b32.xlu0 (%p1531_p9), %v1787_v18, %s3421_s11 }
 0xe6b   : > { %v1880_v28 = vpop.xlane.xlu0 %1879 }
 0xe6c   : > { %v1881_v29 = vmax.f32 %v1880_v28, 1e-30 }
 0xe6e   : > { %2773 = vrcp.f32 %v1881_v29 }
 0xe6f   :  { %v2040_v36 = vpop.permute.xlu0 (%p1531_p9), %2039 }
 0xe70   :  { %2619 = vmatmul.mubr.msk.f32.vlgmr.msra.gmra.mxu1 (%p1531_p9), %vm759_vm6, %v2040_v36 }
 0xe7b   : > { %v2774_v30 = vpop.eup %2773 }
 0xe7c   : > { %v1883_v31 = vmul.f32 %v2774_v30, %v2772_v26 }
 0xe7e   : > { %2597 = vmatmul.mubr.msk.f32.vlgmr.msra.gmra.mxu0 %vm692_vm2, %v1883_v31 }
 0xe7f   :  { %2600 = vmatpush3.msra.mxu0 (%p1531_p9), %v1964_v8  ;;  %2607 = vmatprep.mubr.msk.f32.mxu0 (%p1531_p9), %vm3414_vm5, %v3413_v24 }
 0xe80   :  { %2601 = vmatprep.subr.mxu0 (%p1531_p9), %v3413_v24 }
 0xe81   :  { %2602 = vmatpush3.msra.mxu0 (%p1531_p9), %v1963_v46 }
 0xe82   :  { %2603 = vmatprep.subr.mxu0 (%p1531_p9), %v3413_v24 }
 0xe83   :  { %2604 = vmatpush3.msra.mxu0 (%p1531_p9), %v1962_v50 }
 0xe84   :  { %2605 = vmatprep.subr.mxu0 (%p1531_p9), %v3413_v24 }
 0xe85   :  { %2606 = vmatpush3.msra.mxu0 (%p1531_p9), %v1961_v32 }
 0xe86   :  { %2621 = vmatprep.subr.mxu0 (%p1531_p9), %v3413_v24 }
 0xf30   :  { %v2109_v43 = vpop.f32.mrf.mxu1 (%p1531_p9) }
 0xf32   :  { %v2620_v2 = vpop.f32.mrf.mxu1 (%p1531_p9) }
 0xf3c   :  { %1533 = sbr.rel (!%p1531_p9) target bundleno = 2392 (0x958), region = 309 }
 0xf3e   : > { %v1953_v33 = vpop.f32.mrf.mxu0  }
 0xf3f   : > { %v3954_v49 = vmov %v1953_v33  ;;  %2608 = vmatmul.mubr.msk.f32.vlgmr.msra.gmra.mxu0 (%p1531_p9), %vm759_vm6, %v1953_v33 }
 0xf40   : > { %v2598_v4 = vpop.f32.mrf.mxu0  ;;  %2629 = vmatprep.mubr.msk.f32.mxu0 (%p1531_p9), %vm3414_vm5, %v3413_v24  ;;  %2622 = vmatpush3.msra.mxu0 (%p1531_p9), %v2125_v37  ;;  %v2363_v49 = vld [vmem:[%s3586_s8] ss:$0 sm:$0xff] (%p1531_p9) }
 0xf41   :  { %2623 = vmatprep.subr.mxu0 %v3413_v24 }
 0xf42   :  { %2624 = vmatpush3.msra.mxu0 %v2124_v38 }
 0xf43   :  { %2625 = vmatprep.subr.mxu0 %v3413_v24 }
 0xf44   :  { %2626 = vmatpush3.msra.mxu0 %v2123_v39 }
 0xf45   :  { %2627 = vmatprep.subr.mxu0 %v3413_v24 }
 0xf46   :  { %2628 = vmatpush3.msra.mxu0 %v2122_v40 }
 0xfff   :  { %v2034_v41 = vpop.f32.mrf.mxu0 }
0x1000   :  { %v2110_v1 = vadd.f32 %v2109_v43, %v2034_v41 }
0x1001   :  { %v2609_v42 = vpop.f32.mrf.mxu0 }
0x1002   :  { %v2120_v3 = vadd.f32 %v2362_v44, %v2110_v1 }
0x1004   :  { %v2121_v9 = vmax.f32 %v2120_v3, 0.0 }
0x1006   :  { %2630 = vmatmul.mubr.msk.f32.vlgmr.msra.gmra.mxu0 %vm759_vm6, %v2121_v9 }
0x10c6   :  { %v2202_v45 = vpop.f32.mrf.mxu0 }
0x10c7   :  { %v2203_v51 = vadd.f32 %v2363_v49, %v2202_v45 }
0x10c8   :  { %v2631_v24 = vpop.f32.mrf.mxu0 }
0x10c9   :  { %2207 = vst.msk [vmem:[#allocation40] sm:$0x3] %vm2206_vm11, %v2203_v51 }
0x10ca   :  { %3258 = shalt.err (!%p3255_p0)
}
0x10cb   :  { %2217 = dma.vmem_to_hbm [thread:$0]  %s2215_s22, 32, %s3591_s19, [#allocation4]  }
0x10cc   :  { %3321 = dma.done.wait [#allocation4], 32  }
0x10cd   :  { %3322 = vsyncadd [#allocation4], 4294967264 }
0x10ce   :  { %2221 = vsyncpa [#allocation3], 1 }
0x10cf   :  { %2222 = vsyncpa [#allocation8], 1 }
0x10d0   :  { %2223 = vsyncpa [#allocation11], 1 }
0x10d1   :  { %2224 = vsyncpa [#allocation14], 1 }
0x10d2   :  { %2225 = vsyncpa [#allocation17], 1 }
0x10d3   :  { %2226 = vsyncpa [#allocation20], 1 }
0x10d4   :  { %2227 = vsyncpa [#allocation23], 1 }
0x10d5   :  { %2228 = vsyncpa [#allocation26], 1 }
0x10d6   :  { %2229 = vsyncpa [#allocation29], 1 }
0x10d7   :  { %2230 = vsyncpa [#allocation32], 1 }
0x10d8   :  { %2231 = vsyncpa [#allocation35], 1 }
0x10d9   :  { %2232 = vsyncpa [#allocation38], 1 }
0x10da   :  { %2233 = vsyncpa [#allocation4], 1 }
0x10db   :  { %2234 = vsyncpa [#allocation5], 1 }

</bundles_post_ra>
